<compile_context>
chip_gen: v7x
topology: tpu7x:2x2x1
jax: 0.10.0
libtpu: 0.0.40
codegen_flags: <defaults>
</compile_context>

<pallas_src>
import functools

import jax
import jax.numpy as jnp
from jax import lax
from jax.experimental import pallas as pl
from jax.experimental.pallas import tpu as pltpu


# --------------------------------------------------------------------------- #
# Kernel 1: direct conv (shifted matmuls) + fused BN-statistics accumulation. #
# --------------------------------------------------------------------------- #
def _conv_stats_kernel(x_ref, w_ref, o_ref, stats_ref, *,
                       KH, KW, stride, OH, OW, Cin, Cout):
    n = pl.program_id(0)

    # stats accumulator (2, Cout): row 0 = sum, row 1 = sum of squares.
    @pl.when(n == 0)
    def _():
        stats_ref[...] = jnp.zeros_like(stats_ref)

    x = x_ref[0]                                      # (Hp, Wp, Cin) padded image
    acc = jnp.zeros((OH * OW, Cout), jnp.float32)
    for kh in range(KH):                              # static 3x3 unroll
        for kw in range(KW):
            limit = (kh + (OH - 1) * stride + 1,
                     kw + (OW - 1) * stride + 1,
                     Cin)
            if stride == 1:
                patch = lax.slice(x, (kh, kw, 0), limit)
            else:
                patch = lax.slice(x, (kh, kw, 0), limit,
                                  strides=(stride, stride, 1))
            # (OH, OW, Cin) -> (OH*OW, Cin): trailing dim unchanged, cheap relayout.
            lhs = patch.reshape(OH * OW, Cin)
            acc = acc + jnp.dot(lhs, w_ref[kh * KW + kw],
                                preferred_element_type=jnp.float32)

    o_ref[0] = acc.astype(o_ref.dtype)

    # Fused BatchNorm batch statistics (per output channel).
    s = jnp.sum(acc, axis=0, keepdims=True)           # (1, Cout)
    ss = jnp.sum(acc * acc, axis=0, keepdims=True)    # (1, Cout)
    stats_ref[...] = stats_ref[...] + jnp.concatenate([s, ss], axis=0)


# --------------------------------------------------------------------------- #
# Kernel 2: BN apply (x*scale + shift) + PReLU on a lane-dense slab.          #
# --------------------------------------------------------------------------- #
def _bn_prelu_apply_kernel(x_ref, scale_ref, shift_ref, alpha_ref, o_ref):
    y = x_ref[...] * scale_ref[...] + shift_ref[...]
    a = alpha_ref[0]                                  # PReLU slope from SMEM
    o_ref[...] = jnp.where(y > 0, y, a * y)


# ------------------------------ host wrapper ------------------------------- #
def _pick_row_tile(rows, max_rows=1024):
    """Largest tile <= max_rows that is a multiple of 8 and divides `rows`."""
    if rows <= max_rows:
        return rows
    t = (max_rows // 8) * 8
    while t >= 8:
        if rows % t == 0:
            return t
        t -= 8
    return rows


def convolutional_layer_forward(x, weight, gamma, beta, alpha, *,
                                stride, padding, groups, eps=1e-5):
    """x: (N, Cin, H, W); weight: (Cout, Cin//groups, KH, KW) -> (N, Cout, OH, OW)."""
    N, Cin, H, W = x.shape
    Cout, Cg, KH, KW = weight.shape
    assert Cin == Cg * groups and Cout % groups == 0
    Cpg = Cout // groups

    OH = (H + 2 * padding - KH) // stride + 1
    OW = (W + 2 * padding - KW) // stride + 1
    M = N * OH * OW
    Hp, Wp = H + 2 * padding, W + 2 * padding

    # NCHW -> padded NHWC (single cheap layout pass; no 9x im2col materialization).
    xp = jnp.transpose(x, (0, 2, 3, 1)).astype(jnp.float32)
    xp = jnp.pad(xp, ((0, 0), (padding, padding), (padding, padding), (0, 0)))

    # Per-tap block-diagonal weights (KH*KW, Cin, Cout): groups folded into one
    # matmul so the kernel writes the channel-last slab directly.
    w = jnp.transpose(weight.astype(jnp.float32), (2, 3, 1, 0))      # (KH, KW, Cg, Cout)
    w = w.reshape(KH * KW, Cg, Cout)
    group_mask = (jnp.arange(Cout)[None, :] // Cpg
                  == jnp.arange(groups)[:, None]).astype(jnp.float32)  # (G, Cout)
    w_full = (w[:, None, :, :] * group_mask[None, :, None, :]).reshape(
        KH * KW, Cin, Cout)

    kernel = functools.partial(_conv_stats_kernel, KH=KH, KW=KW, stride=stride,
                               OH=OH, OW=OW, Cin=Cin, Cout=Cout)

    conv, stats = pl.pallas_call(
        kernel,
        out_shape=(jax.ShapeDtypeStruct((N, OH * OW, Cout), jnp.float32),
                   jax.ShapeDtypeStruct((2, Cout), jnp.float32)),
        grid_spec=pltpu.PrefetchScalarGridSpec(
            num_scalar_prefetch=0,
            grid=(N,),
            in_specs=[
                pl.BlockSpec((1, Hp, Wp, Cin), lambda n: (n, 0, 0, 0)),
                pl.BlockSpec((KH * KW, Cin, Cout), lambda n: (0, 0, 0)),  # resident
            ],
            out_specs=(
                pl.BlockSpec((1, OH * OW, Cout), lambda n: (n, 0, 0)),
                pl.BlockSpec((2, Cout), lambda n: (0, 0)),                # accumulator
            ),
        ),
        compiler_params=pltpu.CompilerParams(
            dimension_semantics=("arbitrary",),       # stats block revisited across grid
            vmem_limit_bytes=32 * 1024 * 1024,
        ),
    )(xp, w_full)

    # BN scale/shift from fused batch statistics (training-mode, biased variance).
    mean = stats[0] / M
    var = jnp.maximum(stats[1] / M - mean * mean, 0.0)
    scale = gamma.astype(jnp.float32) * lax.rsqrt(var + eps)         # (Cout,)
    shift = beta.astype(jnp.float32) - mean * scale                  # (Cout,)

    # Lane-dense view for the elementwise pass: fold F rows into the lane dim.
    if Cout <= 128 and 128 % Cout == 0 and M % (128 // Cout) == 0:
        F = 128 // Cout
    else:
        F = 1
    R = M // F
    C_view = F * Cout
    x_view = conv.reshape(R, C_view)                                 # free reshape
    scale_v = jnp.tile(scale, F).reshape(1, C_view)
    shift_v = jnp.tile(shift, F).reshape(1, C_view)
    alpha_s = jnp.asarray(alpha, jnp.float32).reshape(1)

    TR = _pick_row_tile(R)
    y_view = pl.pallas_call(
        _bn_prelu_apply_kernel,
        out_shape=jax.ShapeDtypeStruct((R, C_view), jnp.float32),
        grid_spec=pltpu.PrefetchScalarGridSpec(
            num_scalar_prefetch=0,
            grid=(R // TR,),
            in_specs=[
                pl.BlockSpec((TR, C_view), lambda i: (i, 0)),
                pl.BlockSpec((1, C_view), lambda i: (0, 0)),
                pl.BlockSpec((1, C_view), lambda i: (0, 0)),
                pl.BlockSpec(memory_space=pltpu.MemorySpace.SMEM),   # PReLU alpha scalar
            ],
            out_specs=pl.BlockSpec((TR, C_view), lambda i: (i, 0)),
        ),
        compiler_params=pltpu.CompilerParams(
            dimension_semantics=("parallel",),
            vmem_limit_bytes=32 * 1024 * 1024,
        ),
    )(x_view, scale_v, shift_v, alpha_s)

    y = y_view.reshape(N, OH, OW, Cout)
    return jnp.transpose(y, (0, 3, 1, 2))


# --------------------------- pure-JAX reference ---------------------------- #
def _reference(x, weight, gamma, beta, alpha, *, stride, padding, groups, eps=1e-5):
    conv = lax.conv_general_dilated(
        x, weight,
        window_strides=(stride, stride),
        padding=[(padding, padding), (padding, padding)],
        dimension_numbers=("NCHW", "OIHW", "NCHW"),
        feature_group_count=groups,
    )
    mean = jnp.mean(conv, axis=(0, 2, 3), keepdims=True)
    var = jnp.mean((conv - mean) ** 2, axis=(0, 2, 3), keepdims=True)
    xhat = (conv - mean) * lax.rsqrt(var + eps)
    y = gamma.reshape(1, -1, 1, 1) * xhat + beta.reshape(1, -1, 1, 1)
    return jnp.where(y > 0, y, alpha * y)


# ---------------------------------- main ----------------------------------- #
if __name__ == "__main__":
    # ConvolutionalLayer(4, 8, kernel_size=3, stride=1, padding=1, bias=False, groups=2)
    N, Cin, H, W = 2, 4, 16, 16
    Cout, ksize, stride, padding, groups = 8, 3, 1, 1, 2

    key = jax.random.PRNGKey(0)
    kx, kw = jax.random.split(key)
    x = jax.random.normal(kx, (N, Cin, H, W), dtype=jnp.float32)
    weight = 0.1 * jax.random.normal(kw, (Cout, Cin // groups, ksize, ksize),
                                     dtype=jnp.float32)
    gamma = jnp.ones((Cout,), jnp.float32)    # BatchNorm2d default init
    beta = jnp.zeros((Cout,), jnp.float32)
    alpha = jnp.float32(0.25)                 # nn.PReLU() default shared slope

    fwd = jax.jit(functools.partial(convolutional_layer_forward,
                                    stride=stride, padding=padding, groups=groups))
    out = jax.block_until_ready(fwd(x, weight, gamma, beta, alpha))

    ref = _reference(x, weight, gamma, beta, alpha,
                     stride=stride, padding=padding, groups=groups)
    assert out.shape == (N, Cout, H, W)
    err = float(jnp.max(jnp.abs(out - ref)))
    assert err < 5e-4, f"max abs err {err}"

    print("KERNEL_OK")
</pallas_src>

<mosaic_0001>
module attributes {stable_mosaic.version = 11 : i64} {
  func.func @_conv_stats_kernel(%arg0: i32, %arg1: memref<1x18x18x4xf32, #tpu.memory_space<vmem>>, %arg2: memref<9x4x8xf32, #tpu.memory_space<vmem>>, %arg3: memref<1x256x8xf32, #tpu.memory_space<vmem>>, %arg4: memref<2x8xf32, #tpu.memory_space<vmem>>) attributes {dimension_semantics = [#tpu.dimension_semantics<arbitrary>], iteration_bounds = array<i64: 2>, scalar_prefetch = 0 : i64, scratch_operands = 0 : i64, tpu.core_type = #tpu.core_type<tc>, window_params = [{transform_indices = @transform_0, window_bounds = array<i64: 1, 18, 18, 4>}, {pipeline_mode = #tpu.pipeline_mode<synchronous>, transform_indices = @transform_1, window_bounds = array<i64: 9, 4, 8>}, {transform_indices = @transform_2, window_bounds = array<i64: 1, 256, 8>}, {pipeline_mode = #tpu.pipeline_mode<synchronous>, transform_indices = @transform_3, window_bounds = array<i64: 2, 8>}]} {
    %c0_i32 = arith.constant 0 : i32
    %0 = arith.cmpi eq, %arg0, %c0_i32 : i32
    %1 = arith.extui %0 : i1 to i32
    %c0_i32_0 = arith.constant 0 : i32
    %2 = arith.cmpi ne, %1, %c0_i32_0 : i32
    scf.if %2 {
      %cst_41 = arith.constant 0.000000e+00 : f32
      %72 = vector.broadcast %cst_41 : f32 to vector<2x8xf32>
      %c0_42 = arith.constant 0 : index
      %c0_43 = arith.constant 0 : index
      %73 = vector.load %arg4[%c0_42, %c0_43] : memref<2x8xf32, #tpu.memory_space<vmem>>, vector<2x8xf32>
      tpu.vector_store %arg4[%c0_42, %c0_43], %72 {strides = array<i32>} : memref<2x8xf32, #tpu.memory_space<vmem>>, vector<2x8xf32>,
    } else {
    }
    %c0 = arith.constant 0 : index
    %c0_1 = arith.constant 0 : index
    %c0_2 = arith.constant 0 : index
    %c0_3 = arith.constant 0 : index
    %3 = vector.load %arg1[%c0, %c0_1, %c0_2, %c0_3] : memref<1x18x18x4xf32, #tpu.memory_space<vmem>>, vector<1x18x18x4xf32>
    %4 = vector.shape_cast %3 : vector<1x18x18x4xf32> to vector<18x18x4xf32>
    %cst = arith.constant 0.000000e+00 : f32
    %5 = vector.broadcast %cst : f32 to vector<256x8xf32>
    %6 = vector.extract_strided_slice %4 {offsets = [0, 0, 0], sizes = [16, 16, 4], strides = [1, 1, 1]} : vector<18x18x4xf32> to vector<16x16x4xf32>
    %7 = vector.shape_cast %6 : vector<16x16x4xf32> to vector<256x4xf32>
    %c0_4 = arith.constant 0 : index
    %c0_5 = arith.constant 0 : index
    %c0_6 = arith.constant 0 : index
    %8 = vector.load %arg2[%c0_4, %c0_5, %c0_6] : memref<9x4x8xf32, #tpu.memory_space<vmem>>, vector<1x4x8xf32>
    %9 = vector.shape_cast %8 : vector<1x4x8xf32> to vector<4x8xf32>
    %cst_7 = arith.constant dense<0.000000e+00> : vector<256x8xf32>
    %10 = tpu.matmul %7, %9, %cst_7 {dimension_numbers = #tpu.dot_dimension_numbers<[1], [0], [0], [1], [0, 0, 1, 1], [], []>} : vector<256x4xf32>, vector<4x8xf32>, vector<256x8xf32> -> vector<256x8xf32>
    %11 = arith.addf %5, %10 : vector<256x8xf32>
    %12 = vector.extract_strided_slice %4 {offsets = [0, 1, 0], sizes = [16, 16, 4], strides = [1, 1, 1]} : vector<18x18x4xf32> to vector<16x16x4xf32>
    %13 = vector.shape_cast %12 : vector<16x16x4xf32> to vector<256x4xf32>
    %c1 = arith.constant 1 : index
    %c0_8 = arith.constant 0 : index
    %c0_9 = arith.constant 0 : index
    %14 = vector.load %arg2[%c1, %c0_8, %c0_9] : memref<9x4x8xf32, #tpu.memory_space<vmem>>, vector<1x4x8xf32>
    %15 = vector.shape_cast %14 : vector<1x4x8xf32> to vector<4x8xf32>
    %cst_10 = arith.constant dense<0.000000e+00> : vector<256x8xf32>
    %16 = tpu.matmul %13, %15, %cst_10 {dimension_numbers = #tpu.dot_dimension_numbers<[1], [0], [0], [1], [0, 0, 1, 1], [], []>} : vector<256x4xf32>, vector<4x8xf32>, vector<256x8xf32> -> vector<256x8xf32>
    %17 = arith.addf %11, %16 : vector<256x8xf32>
    %18 = vector.extract_strided_slice %4 {offsets = [0, 2, 0], sizes = [16, 16, 4], strides = [1, 1, 1]} : vector<18x18x4xf32> to vector<16x16x4xf32>
    %19 = vector.shape_cast %18 : vector<16x16x4xf32> to vector<256x4xf32>
    %c2 = arith.constant 2 : index
    %c0_11 = arith.constant 0 : index
    %c0_12 = arith.constant 0 : index
    %20 = vector.load %arg2[%c2, %c0_11, %c0_12] : memref<9x4x8xf32, #tpu.memory_space<vmem>>, vector<1x4x8xf32>
    %21 = vector.shape_cast %20 : vector<1x4x8xf32> to vector<4x8xf32>
    %cst_13 = arith.constant dense<0.000000e+00> : vector<256x8xf32>
    %22 = tpu.matmul %19, %21, %cst_13 {dimension_numbers = #tpu.dot_dimension_numbers<[1], [0], [0], [1], [0, 0, 1, 1], [], []>} : vector<256x4xf32>, vector<4x8xf32>, vector<256x8xf32> -> vector<256x8xf32>
    %23 = arith.addf %17, %22 : vector<256x8xf32>
    %24 = vector.extract_strided_slice %4 {offsets = [1, 0, 0], sizes = [16, 16, 4], strides = [1, 1, 1]} : vector<18x18x4xf32> to vector<16x16x4xf32>
    %25 = vector.shape_cast %24 : vector<16x16x4xf32> to vector<256x4xf32>
    %c3 = arith.constant 3 : index
    %c0_14 = arith.constant 0 : index
    %c0_15 = arith.constant 0 : index
    %26 = vector.load %arg2[%c3, %c0_14, %c0_15] : memref<9x4x8xf32, #tpu.memory_space<vmem>>, vector<1x4x8xf32>
    %27 = vector.shape_cast %26 : vector<1x4x8xf32> to vector<4x8xf32>
    %cst_16 = arith.constant dense<0.000000e+00> : vector<256x8xf32>
    %28 = tpu.matmul %25, %27, %cst_16 {dimension_numbers = #tpu.dot_dimension_numbers<[1], [0], [0], [1], [0, 0, 1, 1], [], []>} : vector<256x4xf32>, vector<4x8xf32>, vector<256x8xf32> -> vector<256x8xf32>
    %29 = arith.addf %23, %28 : vector<256x8xf32>
    %30 = vector.extract_strided_slice %4 {offsets = [1, 1, 0], sizes = [16, 16, 4], strides = [1, 1, 1]} : vector<18x18x4xf32> to vector<16x16x4xf32>
    %31 = vector.shape_cast %30 : vector<16x16x4xf32> to vector<256x4xf32>
    %c4 = arith.constant 4 : index
    %c0_17 = arith.constant 0 : index
    %c0_18 = arith.constant 0 : index
    %32 = vector.load %arg2[%c4, %c0_17, %c0_18] : memref<9x4x8xf32, #tpu.memory_space<vmem>>, vector<1x4x8xf32>
    %33 = vector.shape_cast %32 : vector<1x4x8xf32> to vector<4x8xf32>
    %cst_19 = arith.constant dense<0.000000e+00> : vector<256x8xf32>
    %34 = tpu.matmul %31, %33, %cst_19 {dimension_numbers = #tpu.dot_dimension_numbers<[1], [0], [0], [1], [0, 0, 1, 1], [], []>} : vector<256x4xf32>, vector<4x8xf32>, vector<256x8xf32> -> vector<256x8xf32>
    %35 = arith.addf %29, %34 : vector<256x8xf32>
    %36 = vector.extract_strided_slice %4 {offsets = [1, 2, 0], sizes = [16, 16, 4], strides = [1, 1, 1]} : vector<18x18x4xf32> to vector<16x16x4xf32>
    %37 = vector.shape_cast %36 : vector<16x16x4xf32> to vector<256x4xf32>
    %c5 = arith.constant 5 : index
    %c0_20 = arith.constant 0 : index
    %c0_21 = arith.constant 0 : index
    %38 = vector.load %arg2[%c5, %c0_20, %c0_21] : memref<9x4x8xf32, #tpu.memory_space<vmem>>, vector<1x4x8xf32>
    %39 = vector.shape_cast %38 : vector<1x4x8xf32> to vector<4x8xf32>
    %cst_22 = arith.constant dense<0.000000e+00> : vector<256x8xf32>
    %40 = tpu.matmul %37, %39, %cst_22 {dimension_numbers = #tpu.dot_dimension_numbers<[1], [0], [0], [1], [0, 0, 1, 1], [], []>} : vector<256x4xf32>, vector<4x8xf32>, vector<256x8xf32> -> vector<256x8xf32>
    %41 = arith.addf %35, %40 : vector<256x8xf32>
    %42 = vector.extract_strided_slice %4 {offsets = [2, 0, 0], sizes = [16, 16, 4], strides = [1, 1, 1]} : vector<18x18x4xf32> to vector<16x16x4xf32>
    %43 = vector.shape_cast %42 : vector<16x16x4xf32> to vector<256x4xf32>
    %c6 = arith.constant 6 : index
    %c0_23 = arith.constant 0 : index
    %c0_24 = arith.constant 0 : index
    %44 = vector.load %arg2[%c6, %c0_23, %c0_24] : memref<9x4x8xf32, #tpu.memory_space<vmem>>, vector<1x4x8xf32>
    %45 = vector.shape_cast %44 : vector<1x4x8xf32> to vector<4x8xf32>
    %cst_25 = arith.constant dense<0.000000e+00> : vector<256x8xf32>
    %46 = tpu.matmul %43, %45, %cst_25 {dimension_numbers = #tpu.dot_dimension_numbers<[1], [0], [0], [1], [0, 0, 1, 1], [], []>} : vector<256x4xf32>, vector<4x8xf32>, vector<256x8xf32> -> vector<256x8xf32>
    %47 = arith.addf %41, %46 : vector<256x8xf32>
    %48 = vector.extract_strided_slice %4 {offsets = [2, 1, 0], sizes = [16, 16, 4], strides = [1, 1, 1]} : vector<18x18x4xf32> to vector<16x16x4xf32>
    %49 = vector.shape_cast %48 : vector<16x16x4xf32> to vector<256x4xf32>
    %c7 = arith.constant 7 : index
    %c0_26 = arith.constant 0 : index
    %c0_27 = arith.constant 0 : index
    %50 = vector.load %arg2[%c7, %c0_26, %c0_27] : memref<9x4x8xf32, #tpu.memory_space<vmem>>, vector<1x4x8xf32>
    %51 = vector.shape_cast %50 : vector<1x4x8xf32> to vector<4x8xf32>
    %cst_28 = arith.constant dense<0.000000e+00> : vector<256x8xf32>
    %52 = tpu.matmul %49, %51, %cst_28 {dimension_numbers = #tpu.dot_dimension_numbers<[1], [0], [0], [1], [0, 0, 1, 1], [], []>} : vector<256x4xf32>, vector<4x8xf32>, vector<256x8xf32> -> vector<256x8xf32>
    %53 = arith.addf %47, %52 : vector<256x8xf32>
    %54 = vector.extract_strided_slice %4 {offsets = [2, 2, 0], sizes = [16, 16, 4], strides = [1, 1, 1]} : vector<18x18x4xf32> to vector<16x16x4xf32>
    %55 = vector.shape_cast %54 : vector<16x16x4xf32> to vector<256x4xf32>
    %c8 = arith.constant 8 : index
    %c0_29 = arith.constant 0 : index
    %c0_30 = arith.constant 0 : index
    %56 = vector.load %arg2[%c8, %c0_29, %c0_30] : memref<9x4x8xf32, #tpu.memory_space<vmem>>, vector<1x4x8xf32>
    %57 = vector.shape_cast %56 : vector<1x4x8xf32> to vector<4x8xf32>
    %cst_31 = arith.constant dense<0.000000e+00> : vector<256x8xf32>
    %58 = tpu.matmul %55, %57, %cst_31 {dimension_numbers = #tpu.dot_dimension_numbers<[1], [0], [0], [1], [0, 0, 1, 1], [], []>} : vector<256x4xf32>, vector<4x8xf32>, vector<256x8xf32> -> vector<256x8xf32>
    %59 = arith.addf %53, %58 : vector<256x8xf32>
    %c0_32 = arith.constant 0 : index
    %c0_33 = arith.constant 0 : index
    %c0_34 = arith.constant 0 : index
    %60 = vector.load %arg3[%c0_32, %c0_33, %c0_34] : memref<1x256x8xf32, #tpu.memory_space<vmem>>, vector<1x256x8xf32>
    %61 = vector.shape_cast %60 : vector<1x256x8xf32> to vector<256x8xf32>
    %62 = vector.shape_cast %59 : vector<256x8xf32> to vector<1x256x8xf32>
    tpu.vector_store %arg3[%c0_32, %c0_33, %c0_34], %62 {strides = array<i32>} : memref<1x256x8xf32, #tpu.memory_space<vmem>>, vector<1x256x8xf32>,
    %cst_35 = arith.constant dense<0.000000e+00> : vector<8xf32>
    %63 = vector.multi_reduction <add>, %59, %cst_35 [0] : vector<256x8xf32> to vector<8xf32>
    %64 = vector.shape_cast %63 : vector<8xf32> to vector<1x8xf32>
    %65 = arith.mulf %59, %59 : vector<256x8xf32>
    %cst_36 = arith.constant dense<0.000000e+00> : vector<8xf32>
    %66 = vector.multi_reduction <add>, %65, %cst_36 [0] : vector<256x8xf32> to vector<8xf32>
    %67 = vector.shape_cast %66 : vector<8xf32> to vector<1x8xf32>
    %c0_37 = arith.constant 0 : index
    %c0_38 = arith.constant 0 : index
    %68 = vector.load %arg4[%c0_37, %c0_38] : memref<2x8xf32, #tpu.memory_space<vmem>>, vector<2x8xf32>
    %69 = tpu.concatenate %64, %67 in 0 : vector<1x8xf32>, vector<1x8xf32> -> vector<2x8xf32>
    %70 = arith.addf %68, %69 : vector<2x8xf32>
    %c0_39 = arith.constant 0 : index
    %c0_40 = arith.constant 0 : index
    %71 = vector.load %arg4[%c0_39, %c0_40] : memref<2x8xf32, #tpu.memory_space<vmem>>, vector<2x8xf32>
    tpu.vector_store %arg4[%c0_39, %c0_40], %70 {strides = array<i32>} : memref<2x8xf32, #tpu.memory_space<vmem>>, vector<2x8xf32>,
    return
  }
  func.func @transform_0(%arg0: i32) -> (i32, i32, i32, i32) {
    %c0_i32 = arith.constant 0 : i32
    %c0_i32_0 = arith.constant 0 : i32
    %c0_i32_1 = arith.constant 0 : i32
    %c0_i32_2 = arith.constant 0 : i32
    return %arg0, %c0_i32, %c0_i32_0, %c0_i32_1 : i32, i32, i32, i32
  }
  func.func @transform_1(%arg0: i32) -> (i32, i32, i32) {
    %c0_i32 = arith.constant 0 : i32
    %c0_i32_0 = arith.constant 0 : i32
    %c0_i32_1 = arith.constant 0 : i32
    %c0_i32_2 = arith.constant 0 : i32
    return %c0_i32, %c0_i32_0, %c0_i32_1 : i32, i32, i32
  }
  func.func @transform_2(%arg0: i32) -> (i32, i32, i32) {
    %c0_i32 = arith.constant 0 : i32
    %c0_i32_0 = arith.constant 0 : i32
    %c0_i32_1 = arith.constant 0 : i32
    return %arg0, %c0_i32, %c0_i32_0 : i32, i32, i32
  }
  func.func @transform_3(%arg0: i32) -> (i32, i32) {
    %c0_i32 = arith.constant 0 : i32
    %c0_i32_0 = arith.constant 0 : i32
    %c0_i32_1 = arith.constant 0 : i32
    return %c0_i32, %c0_i32_0 : i32, i32
  }
}

module attributes {stable_mosaic.version = 11 : i64} {
  func.func @_bn_prelu_apply_kernel(%arg0: i32, %arg1: memref<32x128xf32, #tpu.memory_space<vmem>>, %arg2: memref<1x128xf32, #tpu.memory_space<vmem>>, %arg3: memref<1x128xf32, #tpu.memory_space<vmem>>, %arg4: memref<1xf32, #tpu.memory_space<smem>>, %arg5: memref<32x128xf32, #tpu.memory_space<vmem>>) attributes {dimension_semantics = [#tpu.dimension_semantics<parallel>], iteration_bounds = array<i64: 1>, scalar_prefetch = 0 : i64, scratch_operands = 0 : i64, tpu.core_type = #tpu.core_type<tc>, window_params = [{transform_indices = @transform_0, window_bounds = array<i64: 32, 128>}, {pipeline_mode = #tpu.pipeline_mode<synchronous>, transform_indices = @transform_1, window_bounds = array<i64: 1, 128>}, {pipeline_mode = #tpu.pipeline_mode<synchronous>, transform_indices = @transform_2, window_bounds = array<i64: 1, 128>}, {transform_indices = @transform_3, window_bounds = array<i64: 1>}, {transform_indices = @transform_4, window_bounds = array<i64: 32, 128>}]} {
    %c0 = arith.constant 0 : index
    %c0_0 = arith.constant 0 : index
    %0 = vector.load %arg1[%c0, %c0_0] : memref<32x128xf32, #tpu.memory_space<vmem>>, vector<32x128xf32>
    %c0_1 = arith.constant 0 : index
    %c0_2 = arith.constant 0 : index
    %1 = vector.load %arg2[%c0_1, %c0_2] : memref<1x128xf32, #tpu.memory_space<vmem>>, vector<1x128xf32>
    %2 = vector.broadcast %1 : vector<1x128xf32> to vector<32x128xf32>
    %3 = arith.mulf %0, %2 : vector<32x128xf32>
    %c0_3 = arith.constant 0 : index
    %c0_4 = arith.constant 0 : index
    %4 = vector.load %arg3[%c0_3, %c0_4] : memref<1x128xf32, #tpu.memory_space<vmem>>, vector<1x128xf32>
    %5 = vector.broadcast %4 : vector<1x128xf32> to vector<32x128xf32>
    %6 = arith.addf %3, %5 : vector<32x128xf32>
    %c0_5 = arith.constant 0 : index
    %7 = memref.load %arg4[%c0_5] : memref<1xf32, #tpu.memory_space<smem>>
    %cst = arith.constant 0.000000e+00 : f32
    %8 = vector.broadcast %cst : f32 to vector<32x128xf32>
    %9 = arith.cmpf ogt, %6, %8 : vector<32x128xf32>
    %10 = vector.broadcast %7 : f32 to vector<32x128xf32>
    %11 = arith.mulf %10, %6 : vector<32x128xf32>
    %12 = arith.select %9, %6, %11 : vector<32x128xi1>, vector<32x128xf32>
    %c0_6 = arith.constant 0 : index
    %c0_7 = arith.constant 0 : index
    %13 = vector.load %arg5[%c0_6, %c0_7] : memref<32x128xf32, #tpu.memory_space<vmem>>, vector<32x128xf32>
    tpu.vector_store %arg5[%c0_6, %c0_7], %12 {strides = array<i32>} : memref<32x128xf32, #tpu.memory_space<vmem>>, vector<32x128xf32>,
    return
  }
  func.func @transform_0(%arg0: i32) -> (i32, i32) {
    %c0_i32 = arith.constant 0 : i32
    %c0_i32_0 = arith.constant 0 : i32
    return %arg0, %c0_i32 : i32, i32
  }
  func.func @transform_1(%arg0: i32) -> (i32, i32) {
    %c0_i32 = arith.constant 0 : i32
    %c0_i32_0 = arith.constant 0 : i32
    %c0_i32_1 = arith.constant 0 : i32
    return %c0_i32, %c0_i32_0 : i32, i32
  }
  func.func @transform_2(%arg0: i32) -> (i32, i32) {
    %c0_i32 = arith.constant 0 : i32
    %c0_i32_0 = arith.constant 0 : i32
    %c0_i32_1 = arith.constant 0 : i32
    return %c0_i32, %c0_i32_0 : i32, i32
  }
  func.func @transform_3(%arg0: i32) -> i32 {
    %c0_i32 = arith.constant 0 : i32
    %c0_i32_0 = arith.constant 0 : i32
    return %c0_i32 : i32
  }
  func.func @transform_4(%arg0: i32) -> (i32, i32) {
    %c0_i32 = arith.constant 0 : i32
    %c0_i32_0 = arith.constant 0 : i32
    return %arg0, %c0_i32 : i32, i32
  }
}

</mosaic_0001>

<bundles_post_ra>
// kernel: tile.13
= control target key start
LH: loop header
LB: loop body
LE: loop exit
PB: predicated region body
PF: predicated region fallthrough
CT: control target
= control target key end

     0   :  { %s28_s0 = inlined_call_operand.vmem [shape: f32[8], index: 0, kind: input, shape index: {}]   ;;  %s29_s1 = inlined_call_operand.vmem [shape: f32[16,8], index: 1, kind: output, shape index: {}]  }
   0x1   :  { %v4_v0 = vld [vmem:[%s28_s0] ss:$0 sm:$0xff] }
   0x2   :  { %5 = vst [vmem:[%s29_s1] sm:$0xff] %v4_v0  ;;  %8 = vst [vmem:[%s29_s1 + $0x8] sm:$0xff] %v4_v0 }

// kernel: tile.14
= control target key start
LH: loop header
LB: loop body
LE: loop exit
PB: predicated region body
PF: predicated region fallthrough
CT: control target
= control target key end

     0   :  { %s131_s10 = smov 120   ;;  %s132_s11 = smov 104   ;;  %vm3_vm0 = vcmask 64512   ;;  %vm9_vm1 = vcmask 1048512   ;;  %vm15_vm2 = vcmask 982912   ;;  %vm21_vm3 = vcmask 917312   ;;  %s207_s0 = inlined_call_operand.vmem [shape: f32[16,8], index: 0, kind: input, shape index: {}]   ;;  %s208_s1 = inlined_call_operand.vmem [shape: f32[1,128], index: 1, kind: output, shape index: {}]  }
   0x1   :  { %v101_v0 = vld [vmem:[%s207_s0 + $0xf] sm:$0x1]   ;;  %v103_v1 = vld [vmem:[%s207_s0 + $0xd] sm:$0x1]   ;;  %v102_v2 = vld [vmem:[%s207_s0 + $0xe] sm:$0x1]  }
   0x2   :  { %7 = vrot.lane.b32.xlu0 %v101_v0, %s131_s10  ;;  %19 = vrot.lane.b32.xlu1 %v103_v1, %s132_s11  ;;  %v104_v3 = vld [vmem:[%s207_s0 + $0xc] sm:$0x1]   ;;  %s133_s16 = smov 112   ;;  %s134_s17 = smov 96   ;;  %v105_v4 = vld [vmem:[%s207_s0 + $0xb] sm:$0x1]  }
   0x3   :  { %v106_v5 = vld [vmem:[%s207_s0 + $0xa] sm:$0x1]   ;;  %v2_v6 = vld [vmem:[%s207_s0] sm:$0x1]   ;;  %s135_s24 = smov 88   ;;  %s136_s25 = smov 80  }
   0x4   :  { %4 = vst.msk [vmem:[#allocation0] sm:$0x1] %vm3_vm0, %v2_v6   ;;  %v107_v7 = vld [vmem:[%s207_s0 + $0x9] sm:$0x1]   ;;  %v108_v8 = vld [vmem:[%s207_s0 + $0x8] sm:$0x1]  }
   0x5   :  { %s137_s30 = smov 72   ;;  %s138_s2 = smov 64   ;;  %v109_v9 = vld [vmem:[%s207_s0 + $0x7] sm:$0x1]   ;;  %v110_v10 = vld [vmem:[%s207_s0 + $0x6] sm:$0x1]  }
   0x6   :  { %13 = vrot.lane.b32.xlu0 %v102_v2, %s133_s16  ;;  %25 = vrot.lane.b32.xlu1 %v104_v3, %s134_s17  ;;  %s139_s7 = smov 56   ;;  %s140_s8 = smov 48   ;;  %v111_v11 = vld [vmem:[%s207_s0 + $0x5] sm:$0x1]   ;;  %v112_v12 = vld [vmem:[%s207_s0 + $0x4] sm:$0x1]  }
   0x7   :  { %s141_s13 = smov 40   ;;  %s142_s14 = smov 32   ;;  %v113_v13 = vld [vmem:[%s207_s0 + $0x3] sm:$0x1]   ;;  %v114_v14 = vld [vmem:[%s207_s0 + $0x2] sm:$0x1]  }
   0x8   :  { %s143_s19 = smov 24   ;;  %s144_s20 = smov 16   ;;  %v115_v15 = vld [vmem:[%s207_s0 + $0x1] sm:$0x1]   ;;  %vm27_vm4 = vcmask 851712   ;;  %vm33_vm5 = vcmask 786112  }
   0x9   :  { %s145_s0 = smov 8   ;;  %vm39_vm6 = vcmask 720512   ;;  %vm45_vm7 = vcmask 654912   ;;  %vm51_vm8 = vcmask 589312   ;;  %vm57_vm9 = vcmask 523712  }
   0xa   :  { %31 = vrot.lane.b32.xlu0 %v105_v4, %s135_s24  ;;  %37 = vrot.lane.b32.xlu1 %v106_v5, %s136_s25  ;;  %vm63_vm10 = vcmask 458112   ;;  %vm69_vm11 = vcmask 392512   ;;  %vm75_vm12 = vcmask 326912   ;;  %vm81_vm13 = vcmask 261312  }
   0xb   :  { %vm87_vm14 = vcmask 195712   ;;  %vm93_vm15 = vcmask 130112  }
   0xe   :  { %43 = vrot.lane.b32.xlu0 %v107_v7, %s137_s30  ;;  %49 = vrot.lane.b32.xlu1 %v108_v8, %s138_s2 }
  0x12   :  { %55 = vrot.lane.b32.xlu0 %v109_v9, %s139_s7  ;;  %61 = vrot.lane.b32.xlu1 %v110_v10, %s140_s8 }
  0x16   :  { %67 = vrot.lane.b32.xlu0 %v111_v11, %s141_s13  ;;  %73 = vrot.lane.b32.xlu1 %v112_v12, %s142_s14 }
  0x1a   :  { %79 = vrot.lane.b32.xlu0 %v113_v13, %s143_s19  ;;  %85 = vrot.lane.b32.xlu1 %v114_v14, %s144_s20 }
  0x1e   :  { %91 = vrot.lane.b32.xlu0 %v115_v15, %s145_s0 }
  0x74   :  { %v8_v16 = vpop.permute.xlu0 %7   ;;  %v20_v17 = vpop.permute.xlu1 %19  }
  0x75   :  { %10 = vst.msk [vmem:[#allocation0] sm:$0x1] %vm9_vm1, %v8_v16  }
  0x78   :  { %v14_v18 = vpop.permute.xlu0 %13   ;;  %v26_v19 = vpop.permute.xlu1 %25  }
  0x79   :  { %16 = vst.msk [vmem:[#allocation0] sm:$0x1] %vm15_vm2, %v14_v18  }
  0x7a   :  { %22 = vst.msk [vmem:[#allocation0] sm:$0x1] %vm21_vm3, %v20_v17  }
  0x7b   :  { %28 = vst.msk [vmem:[#allocation0] sm:$0x1] %vm27_vm4, %v26_v19  }
  0x7c   :  { %v32_v20 = vpop.permute.xlu0 %31   ;;  %v38_v21 = vpop.permute.xlu1 %37  }
  0x7d   :  { %34 = vst.msk [vmem:[#allocation0] sm:$0x1] %vm33_vm5, %v32_v20  }
  0x7e   :  { %40 = vst.msk [vmem:[#allocation0] sm:$0x1] %vm39_vm6, %v38_v21  }
  0x80   :  { %v44_v22 = vpop.permute.xlu0 %43   ;;  %v50_v23 = vpop.permute.xlu1 %49  }
  0x81   :  { %46 = vst.msk [vmem:[#allocation0] sm:$0x1] %vm45_vm7, %v44_v22  }
  0x82   :  { %52 = vst.msk [vmem:[#allocation0] sm:$0x1] %vm51_vm8, %v50_v23  }
  0x84   :  { %v56_v24 = vpop.permute.xlu0 %55   ;;  %v62_v25 = vpop.permute.xlu1 %61  }
  0x85   :  { %58 = vst.msk [vmem:[#allocation0] sm:$0x1] %vm57_vm9, %v56_v24  }
  0x86   :  { %64 = vst.msk [vmem:[#allocation0] sm:$0x1] %vm63_vm10, %v62_v25  }
  0x88   :  { %v68_v26 = vpop.permute.xlu0 %67   ;;  %v74_v27 = vpop.permute.xlu1 %73  }
  0x89   :  { %70 = vst.msk [vmem:[#allocation0] sm:$0x1] %vm69_vm11, %v68_v26  }
  0x8a   :  { %76 = vst.msk [vmem:[#allocation0] sm:$0x1] %vm75_vm12, %v74_v27  }
  0x8c   :  { %v80_v28 = vpop.permute.xlu0 %79   ;;  %v86_v29 = vpop.permute.xlu1 %85  }
  0x8d   :  { %82 = vst.msk [vmem:[#allocation0] sm:$0x1] %vm81_vm13, %v80_v28  }
  0x8e   :  { %88 = vst.msk [vmem:[#allocation0] sm:$0x1] %vm87_vm14, %v86_v29  }
  0x90   :  { %v92_v30 = vpop.permute.xlu0 %91  }
  0x91   :  { %94 = vst.msk [vmem:[#allocation0] sm:$0x1] %vm93_vm15, %v92_v30  }
  0x98   :  { %v98_v31 = vld [vmem:[#allocation0] sm:$0x1] }
  0x99   :  { %100 = vst [vmem:[%s208_s1] sm:$0x1] %v98_v31 }

// kernel: convolutional_layer_forward.3
= control target key start
LH: loop header
LB: loop body
LE: loop exit
PB: predicated region body
PF: predicated region fallthrough
CT: control target
= control target key end

     0   :  { %s126_s0 = inlined_call_operand.vmem [shape: f32[32,128], index: 0, kind: input, shape index: {}]   ;;  %s127_s1 = inlined_call_operand.vmem [shape: f32[1,128], index: 1, kind: input, shape index: {}]   ;;  %s128_s2 = inlined_call_operand.vmem [shape: f32[1,128], index: 2, kind: input, shape index: {}]   ;;  %s129_s3 = inlined_call_operand.<no memory space> [shape: f32[1], index: 3, kind: input, shape index: {}]   ;;  %s130_s4 = inlined_call_operand.vmem [shape: f32[32,128], index: 4, kind: output, shape index: {}]  }
   0x1   :  { %v18_v0 = vld [vmem:[%s126_s0] sm:$0xff]  ;;  %v19_v4 = vld [vmem:[%s126_s0 + $0x8] sm:$0xff]  ;;  %v20_v5 = vld [vmem:[%s126_s0 + $0x10] sm:$0xff]  ;;  %v49_v7 = vstv %s129_s3 }
   0x2   :  { %v66_v1 = vld [vmem:[%s127_s1] ss:$0 sm:$0xff]  ;;  %v21_v6 = vld [vmem:[%s126_s0 + $0x18] sm:$0xff] }
   0x3   :  { %v67_v2 = vld [vmem:[%s128_s2] ss:$0 sm:$0xff]  ;;  %v29_v3 = vmul.f32 %v66_v1, %v18_v0  ;;  %v30_v8 = vmul.f32 %v66_v1, %v19_v4  ;;  %v31_v9 = vmul.f32 %v66_v1, %v20_v5  ;;  %v32_v10 = vmul.f32 %v66_v1, %v21_v6 }
   0x5   :  { %v40_v11 = vadd.f32 %v67_v2, %v29_v3  ;;  %v41_v12 = vadd.f32 %v67_v2, %v30_v8  ;;  %v42_v13 = vadd.f32 %v67_v2, %v31_v9  ;;  %v43_v14 = vadd.f32 %v67_v2, %v32_v10 }
   0x7   :  { %vm45_vm0 = vcmp.gt.f32.partialorder %v40_v11, 0.0  ;;  %v50_v15 = vmul.f32 %v49_v7, %v40_v11  ;;  %vm46_vm1 = vcmp.gt.f32.partialorder %v41_v12, 0.0  ;;  %v51_v16 = vmul.f32 %v49_v7, %v41_v12 }
   0x8   :  { %vm47_vm2 = vcmp.gt.f32.partialorder %v42_v13, 0.0  ;;  %v52_v17 = vmul.f32 %v49_v7, %v42_v13  ;;  %vm48_vm3 = vcmp.gt.f32.partialorder %v43_v14, 0.0  ;;  %v53_v19 = vmul.f32 %v49_v7, %v43_v14 }
   0x9   :  { %v54_v18 = vsel %vm45_vm0, %v40_v11, %v50_v15  ;;  %v55_v20 = vsel %vm46_vm1, %v41_v12, %v51_v16 }
   0xa   :  { %58 = vst [vmem:[%s130_s4] sm:$0xff] %v54_v18  ;;  %v56_v21 = vsel %vm47_vm2, %v42_v13, %v52_v17  ;;  %59 = vst [vmem:[%s130_s4 + $0x8] sm:$0xff] %v55_v20  ;;  %v57_v22 = vsel %vm48_vm3, %v43_v14, %v53_v19 }
   0xb   :  { %60 = vst [vmem:[%s130_s4 + $0x10] sm:$0xff] %v56_v21  ;;  %61 = vst [vmem:[%s130_s4 + $0x18] sm:$0xff] %v57_v22 }

// kernel: convolutional_layer_forward.2
= control target key start
LH: loop header
LB: loop body
LE: loop exit
PB: predicated region body
PF: predicated region fallthrough
CT: control target
= control target key end

     0   :  { %s4607_s12 = smov 0   ;;  %s5892_s0 = inlined_call_operand.vmem [shape: f32[2,18,18,4], index: 0, kind: input, shape index: {}]   ;;  %s5893_s1 = inlined_call_operand.vmem [shape: f32[9,4,8], index: 1, kind: input, shape index: {}]   ;;  %s5894_s2 = inlined_call_operand.vmem [shape: f32[2,256,8], index: 2, kind: output, shape index: {0}]   ;;  %s5895_s3 = inlined_call_operand.vmem [shape: f32[2,8], index: 3, kind: output, shape index: {1}]  }
   0x1 LB: > { %s3246_s13 = sadd.s32 4294967295, %s4584_s12   ;;  %p3250_p0 = scmp.ge.s32.totalorder %s4584_s12, 1  ;;  %s4584_s12 = sphi %s4607_s12, %s14_s12  }
   0x2   : > { %p135_p1 = scmp.lt.s32.totalorder %s4584_s12, 3 }
   0x4   : > { %p136_p2 = pnand %p3250_p0, %p135_p1 }
   0x6   : > { %139 = sbr.rel (%p136_p2) target bundleno = 553 (0x229), region = 28 }
   0xd   : > { %p159_p3 = scmp.lt.s32.totalorder %s3246_s13, 1  ;;  %p3254_p4 = scmp.ne.s32.totalorder %s3246_s13, 0 }
   0xe   : > { %vm173_vm0 = vcmask (!%p3254_p4), 58368   ;;  %v4586_v0 = vmov (!%p3254_p4), 0.0  }
   0xf   : > { %s160_s14 = scalar_select %p159_p3, %s3246_s13, 1 }
  0x10   : > { %172 = sbr.rel (%p3254_p4) target bundleno = 23 (0x17), region = 32  ;;  %174 = vst.msk [vmem:[%s5895_s3] sm:$0x3] (!%p3254_p4), %vm173_vm0, %v4586_v0 }
  0x11   : > { %s4568_s15 = smul.u32 432, %s160_s14  ;;  %s3562_s16 = sshll.u32 %s160_s14, 8 }
  0x12   : > { %s4618_s19 = scalar_lea.vmem %s5894_s2, %s3562_s16 }
  0x13   : > { %s4623_s22 = scalar_lea.vmem %s5892_s0, %s4568_s15 }
  0x17 PF: > { %v3255_v1 = vld [vmem:[%s5893_s1 + $0x4] sm:$0xf]  ;;  %vm426_vm1 = vcmask 1043456   ;;  %v4634_v2 = vld [vmem:[%s5893_s1 + $0x10] sm:$0xf]  ;;  %v4643_v4 = vld [vmem:[%s4623_s22 + $0x8] sm:$0xff] }
  0x18   : > { %v4637_v3 = vld [vmem:[%s4623_s22] sm:$0xff]  ;;  %3860 = vmatprep.subr.msk.mxu1 %vm426_vm1, %v3255_v1  ;;  %4060 = vmatprep.subr.msk.mxu0 %vm426_vm1, %v4634_v2  ;;  %vm278_vm2 = vcmask 1046528   ;;  %v280_v7 = vrot.slane %v4643_v4, 1  ;;  %vm361_vm3 = vcmask 31744   ;;  %v4654_v8 = vld [vmem:[%s4623_s22 + $0x18] sm:$0xff]  ;;  %v4676_v18 = vld [vmem:[%s4623_s22 + $0x30] sm:$0xff] }
  0x19   : > { %v279_v5 = vrot.slane %v4637_v3, 1  ;;  %v229_v6 = vld [vmem:[%s5893_s1] sm:$0xf]  ;;  %3861 = vmatpush3.msk.msra.mxu1 %vm426_vm1, %v3255_v1  ;;  %4061 = vmatpush3.msk.msra.mxu0 %vm426_vm1, %v4634_v2  ;;  %5969 = vst [vmem:[#allocation2_spill] sm:$0xff] %v4654_v8  ;;  %v3424_v10 = vld [vmem:[%s5893_s1 + $0x14] sm:$0xf] }
  0x1a   : > { %v4657_v9 = vld [vmem:[%s4623_s22 + $0x20] sm:$0xff]  ;;  %3910 = vmatprep.subr.msk.mxu1 %vm426_vm1, %v229_v6  ;;  %v284_v11 = vrot.slane %v4654_v8, 1  ;;  %4110 = vmatprep.subr.msk.mxu0 %vm426_vm1, %v3424_v10  ;;  %v4667_v13 = vld [vmem:[%s4623_s22 + $0x10] sm:$0x3]  ;;  %v4670_v14 = vld [vmem:[%s4623_s22 + $0x28] sm:$0x3] }
  0x1b   : > { %5970 = vst [vmem:[#allocation3_spill] sm:$0xff] %v4657_v9  ;;  %v285_v12 = vrot.slane %v4657_v9, 1  ;;  %v281_v15 = vsel %vm278_vm2, %v279_v5, %v280_v7  ;;  %v282_v16 = vrot.slane %v4667_v13, 1  ;;  %v287_v17 = vrot.slane %v4670_v14, 1  ;;  %v4679_v19 = vld [vmem:[%s4623_s22 + $0x38] sm:$0xff]  ;;  %v4682_v20 = vld [vmem:[%s4623_s22 + $0x48] sm:$0xff] }
  0x1c   : > { %3862 = vmatprep.mubr.msk.f32.mxu1 %vm361_vm3, %v281_v15  ;;  %v289_v22 = vrot.slane %v4676_v18, 1  ;;  %v290_v23 = vrot.slane %v4679_v19, 1  ;;  %v4689_v24 = vld [vmem:[%s4623_s22 + $0x40] sm:$0x3]  ;;  %v4692_v25 = vld [vmem:[%s4623_s22 + $0x50] sm:$0xff]  ;;  %v294_v29 = vrot.slane %v4682_v20, 1 }
  0x1d   : > { %v286_v21 = vsel %vm278_vm2, %v284_v11, %v285_v12  ;;  %v283_v26 = vsel %vm278_vm2, %v280_v7, %v282_v16  ;;  %v288_v27 = vsel %vm278_vm2, %v285_v12, %v287_v17  ;;  %v292_v28 = vrot.slane %v4689_v24, 1  ;;  %v4700_v30 = vld [vmem:[%s4623_s22 + $0x58] sm:$0x3]  ;;  %v4703_v31 = vld [vmem:[%s4623_s22 + $0x60] sm:$0xff]  ;;  %v4706_v32 = vld [vmem:[%s4623_s22 + $0x68] sm:$0xff] }
  0x1e   : > { %4062 = vmatprep.mubr.msk.f32.mxu0 %vm361_vm3, %v286_v21  ;;  %3863 = vmatmul.mubr.msk.f32.vlgmr.msra.gmra.mrb[0].mxu1 %vm361_vm3, %v283_v26  ;;  %v4711_v33 = vsel %vm278_vm2, %v289_v22, %v290_v23  ;;  %v295_v34 = vrot.slane %v4692_v25, 1  ;;  %v297_v36 = vrot.slane %v4700_v30, 1  ;;  %v299_v38 = vrot.slane %v4703_v31, 1  ;;  %v4729_v40 = vld [vmem:[%s4623_s22 + $0x70] sm:$0x3]  ;;  %v4732_v41 = vld [vmem:[%s4623_s22 + $0x78] sm:$0xff] }
  0x1f   : > { %4063 = vmatmul.mubr.msk.f32.vlgmr.msra.gmra.mrb[0].mxu0 %vm361_vm3, %v288_v27  ;;  %5971 = vst [vmem:[#allocation4_spill] sm:$0xff] %v4711_v33  ;;  %3911 = vmatpush3.msk.msra.mxu1 %vm426_vm1, %v229_v6  ;;  %v4717_v35 = vsel %vm278_vm2, %v290_v23, %v292_v28  ;;  %v300_v39 = vrot.slane %v4706_v32, 1  ;;  %v4735_v42 = vld [vmem:[%s4623_s22 + $0x80] sm:$0xff]  ;;  %v302_v44 = vrot.slane %v4729_v40, 1  ;;  %v4751_v45 = vld [vmem:[%s5893_s1 + $0x18] sm:$0xf] }
  0x20   : > { %4111 = vmatpush3.msk.msra.mxu0 %vm426_vm1, %v3424_v10  ;;  %5972 = vst [vmem:[#allocation5_spill] sm:$0xff] %v4717_v35  ;;  %3865 = vmatprep.mubr.msk.f32.mxu1 %vm361_vm3, %v286_v21  ;;  %v4724_v37 = vsel %vm278_vm2, %v294_v29, %v295_v34  ;;  %v4745_v43 = vsel %vm278_vm2, %v295_v34, %v297_v36  ;;  %v304_v47 = vrot.slane %v4732_v41, 1  ;;  %v305_v48 = vrot.slane %v4735_v42, 1  ;;  %v4759_v49 = vld [vmem:[%s4623_s22 + $0x88] sm:$0x3]  ;;  %v4764_v50 = vld [vmem:[%s4623_s22 + $0x90] sm:$0xff] }
  0x21   : > { %4065 = vmatprep.mubr.msk.f32.mxu0 %vm361_vm3, %v4711_v33  ;;  %5973 = vst [vmem:[#allocation6_spill] sm:$0xff] %v4724_v37  ;;  %5974 = vst [vmem:[#allocation7_spill] sm:$0xff] %v4745_v43  ;;  %v4754_v46 = vsel %vm278_vm2, %v299_v38, %v300_v39  ;;  %4160 = vmatprep.subr.msk.mxu0 %vm426_vm1, %v4751_v45  ;;  %v4767_v51 = vld [vmem:[%s4623_s22 + $0x98] sm:$0xff]  ;;  %v4778_v52 = vsel %vm278_vm2, %v300_v39, %v302_v44  ;;  %v307_v53 = vrot.slane %v4759_v49, 1  ;;  %v4787_v57 = vld [vmem:[%s4623_s22 + $0xa0] sm:$0x3] }
  0x22   : > { %3866 = vmatmul.mubr.msk.f32.gmra.mrb[2].mxu1 %vm361_vm3, %v288_v27  ;;  %5975 = vst [vmem:[#allocation8_spill] sm:$0xff] %v4754_v46  ;;  %5976 = vst [vmem:[#allocation9_spill] sm:$0xff] %v4778_v52  ;;  %v4782_v54 = vsel %vm278_vm2, %v304_v47, %v305_v48  ;;  %v309_v55 = vrot.slane %v4764_v50, 1  ;;  %v310_v56 = vrot.slane %v4767_v51, 1  ;;  %v4790_v58 = vld [vmem:[%s4623_s22 + $0xa8] sm:$0xff]  ;;  %v4793_v59 = vld [vmem:[%s4623_s22 + $0xb0] sm:$0xff] }
  0x23   : > { %4066 = vmatmul.mubr.msk.f32.gmra.mrb[2].mxu0 %vm361_vm3, %v4717_v35  ;;  %3868 = vmatprep.mubr.msk.f32.mxu1 %vm361_vm3, %v4711_v33  ;;  %5977 = vst [vmem:[#allocation10_spill] sm:$0xff] %v4782_v54  ;;  %v4804_v60 = vsel %vm278_vm2, %v305_v48, %v307_v53  ;;  %v312_v61 = vrot.slane %v4787_v57, 1  ;;  %v314_v63 = vrot.slane %v4790_v58, 1  ;;  %v315_v0 = vrot.slane %v4793_v59, 1  ;;  %v4813_v1 = vld [vmem:[%s4623_s22 + $0xb8] sm:$0x3] }
  0x24   : > { %4068 = vmatprep.mubr.msk.f32.mxu0 %vm361_vm3, %v4724_v37  ;;  %5978 = vst [vmem:[#allocation11_spill] sm:$0xff] %v4804_v60  ;;  %v4808_v62 = vsel %vm278_vm2, %v309_v55, %v310_v56  ;;  %v4818_v5 = vld [vmem:[%s5893_s1 + $0x8] sm:$0xf]  ;;  %v4821_v6 = vld [vmem:[%s4623_s22 + $0xc0] sm:$0xff]  ;;  %v317_v11 = vrot.slane %v4813_v1, 1  ;;  %v953_v26 = vrot.slane %v4654_v8, 2 }
  0x25   : > { %5979 = vst [vmem:[#allocation12_spill] sm:$0xff] %v4808_v62  ;;  %v4824_v7 = vld [vmem:[%s4623_s22 + $0xc8] sm:$0xff]  ;;  %3960 = vmatprep.subr.msk.mxu1 %vm426_vm1, %v4818_v5  ;;  %v4837_v10 = vsel %vm278_vm2, %v310_v56, %v312_v61  ;;  %v4841_v12 = vsel %vm278_vm2, %v314_v63, %v315_v0  ;;  %v319_v15 = vrot.slane %v4821_v6, 1  ;;  %v4846_v17 = vld [vmem:[%s4623_s22 + $0xd0] sm:$0x3]  ;;  %v954_v27 = vrot.slane %v4657_v9, 2 }
  0x26   : > { %3869 = vmatmul.mubr.msk.f32.gmra.mrb[4].mxu1 %vm361_vm3, %v4717_v35  ;;  %5980 = vst [vmem:[#allocation13_spill] sm:$0xff] %v4837_v10  ;;  %5981 = vst [vmem:[#allocation14_spill] sm:$0xff] %v4841_v12  ;;  %v320_v16 = vrot.slane %v4824_v7, 1  ;;  %v4857_v21 = vsel %vm278_vm2, %v315_v0, %v317_v11  ;;  %v322_v22 = vrot.slane %v4846_v17, 1  ;;  %vm947_vm4 = vcmask 1045504   ;;  %v4866_v28 = vld [vmem:[%s4623_s22 + $0xd8] sm:$0xff] }
  0x27   : > { %4069 = vmatmul.mubr.msk.f32.gmra.mrb[4].mxu0 %vm361_vm3, %v4745_v43  ;;  %3871 = vmatprep.mubr.msk.f32.mxu1 %vm361_vm3, %v4724_v37  ;;  %5982 = vst [vmem:[#allocation15_spill] sm:$0xff] %v4857_v21  ;;  %v4869_v29 = vld [vmem:[%s4623_s22 + $0xe0] sm:$0xff]  ;;  %v956_v34 = vrot.slane %v4670_v14, 2  ;;  %v4884_v38 = vld [vmem:[%s4623_s22 + $0xe8] sm:$0x3]  ;;  %v4887_v39 = vsel %vm947_vm4, %v953_v26, %v954_v27  ;;  %v324_v14 = vrot.slane %v4866_v28, 1 }
  0x28   : > { %4071 = vmatprep.mubr.msk.f32.mxu0 %vm361_vm3, %v4754_v46  ;;  %v4861_v23 = vsel %vm278_vm2, %v319_v15, %v320_v16  ;;  %v4881_v36 = vsel %vm278_vm2, %v320_v16, %v322_v22  ;;  %v325_v44 = vrot.slane %v4869_v29, 1  ;;  %v4892_v47 = vld [vmem:[%s4623_s22 + $0xf0] sm:$0xff]  ;;  %v4895_v48 = vld [vmem:[%s4623_s22 + $0xf8] sm:$0xff]  ;;  %v958_v53 = vrot.slane %v4676_v18, 2  ;;  %v4917_v22 = vld [vmem:[%s4623_s22 + $0x100] sm:$0x3] }
  0x29   : > { %5983 = vst [vmem:[#allocation16_spill] sm:$0xff] %v4861_v23  ;;  %5984 = vst [vmem:[#allocation17_spill] sm:$0xff] %v4881_v36  ;;  %v959_v55 = vrot.slane %v4679_v19, 2  ;;  %v4904_v56 = vsel %vm947_vm4, %v954_v27, %v956_v34  ;;  %v327_v61 = vrot.slane %v4884_v38, 1  ;;  %v961_v63 = vrot.slane %v4689_v24, 2  ;;  %v4926_v27 = vld [vmem:[%s4623_s22 + $0x108] sm:$0xff] }
  0x2a   : > { %3872 = vmatmul.mubr.msk.f32.gmra.mrb[6].mxu1 %vm361_vm3, %v4745_v43  ;;  %v329_v0 = vrot.slane %v4892_v47, 1  ;;  %v330_v11 = vrot.slane %v4895_v48, 1  ;;  %v963_v15 = vrot.slane %v4682_v20, 2  ;;  %v964_v16 = vrot.slane %v4692_v25, 2  ;;  %v4929_v34 = vld [vmem:[%s4623_s22 + $0x110] sm:$0xff] }
  0x2b   : > { %4072 = vmatmul.mubr.msk.f32.gmra.mrb[6].mxu0 %vm361_vm3, %v4778_v52  ;;  %3874 = vmatprep.mubr.msk.f32.mxu1 %vm361_vm3, %v4754_v46  ;;  %v4920_v26 = vsel %vm278_vm2, %v324_v14, %v325_v44  ;;  %v4923_v24 = vsel %vm947_vm4, %v958_v53, %v959_v55  ;;  %v4941_v14 = vsel %vm278_vm2, %v325_v44, %v327_v61  ;;  %v332_v53 = vrot.slane %v4917_v22, 1  ;;  %v4959_v44 = vld [vmem:[%s4623_s22 + $0x118] sm:$0x3]  ;;  %v5040_v33 = vld [vmem:[%s4623_s22 + $0x150] sm:$0xff] }
  0x2c   : > { %4074 = vmatprep.mubr.msk.f32.mxu0 %vm361_vm3, %v4782_v54  ;;  %5985 = vst [vmem:[#allocation18_spill] sm:$0xff] %v4920_v26  ;;  %5986 = vst [vmem:[#allocation19_spill] sm:$0xff] %v4941_v14  ;;  %v968_v61 = vrot.slane %v4703_v31, 2  ;;  %v979_v35 = vrot.slane %v4767_v51, 2  ;;  %vm2976_vm5 = vcmask 64512   ;;  %vm3180_vm6 = vcmask 1040384  }
  0x2d   : > { %vm3183_vm7 = vcmask 58368  }
  0x2e   : > { %3875 = vmatmul.mubr.msk.f32.gmra.mrb[8].mxu1 %vm361_vm3, %v4778_v52  ;;  %v5008_v52 = vld [vmem:[%s4623_s22 + $0x140] sm:$0xff] }
  0x2f   : > { %4075 = vmatmul.mubr.msk.f32.gmra.mrb[8].mxu0 %vm361_vm3, %v4804_v60  ;;  %3877 = vmatprep.mubr.msk.f32.mxu1 %vm361_vm3, %v4782_v54 }
  0x30   : > { %4077 = vmatprep.mubr.msk.f32.mxu0 %vm361_vm3, %v4808_v62 }
  0x32   : > { %3878 = vmatmul.mubr.msk.f32.gmra.mrb[10].mxu1 %vm361_vm3, %v4804_v60  ;;  %v971_v60 = vrot.slane %v4729_v40, 2 }
  0x33   : > { %4078 = vmatmul.mubr.msk.f32.gmra.mrb[10].mxu0 %vm361_vm3, %v4837_v10  ;;  %3880 = vmatprep.mubr.msk.f32.mxu1 %vm361_vm3, %v4808_v62  ;;  %v337_v62 = vrot.slane %v4959_v44, 1 }
  0x34   : > { %4080 = vmatprep.mubr.msk.f32.mxu0 %vm361_vm3, %v4841_v12 }
  0x36   : > { %3881 = vmatmul.mubr.msk.f32.gmra.mrb[12].mxu1 %vm361_vm3, %v4837_v10  ;;  %v4956_v10 = vsel %vm947_vm4, %v963_v15, %v964_v16  ;;  %v4980_v15 = vsel %vm278_vm2, %v330_v11, %v332_v53  ;;  %v974_v53 = vrot.slane %v4735_v42, 2 }
  0x37   : > { %4081 = vmatmul.mubr.msk.f32.gmra.mrb[12].mxu0 %vm361_vm3, %v4857_v21  ;;  %3883 = vmatprep.mubr.msk.f32.mxu1 %vm361_vm3, %v4841_v12  ;;  %v4953_v12 = vsel %vm278_vm2, %v329_v0, %v330_v11  ;;  %5988 = vst [vmem:[#allocation21_spill] sm:$0xff] %v4956_v10  ;;  %v4971_v0 = vld [vmem:[%s4623_s22 + $0x128] sm:$0xff]  ;;  %5989 = vst [vmem:[#allocation22_spill] sm:$0xff] %v4980_v15  ;;  %v973_v11 = vrot.slane %v4732_v41, 2 }
  0x38   : > { %4083 = vmatprep.mubr.msk.f32.mxu0 %vm361_vm3, %v4861_v23  ;;  %5987 = vst [vmem:[#allocation20_spill] sm:$0xff] %v4953_v12  ;;  %v340_v54 = vrot.slane %v4971_v0, 1 }
  0x39   : > { %v5030_v37 = vsel %vm947_vm4, %v973_v11, %v974_v53 }
  0x3a   : > { %3884 = vmatmul.mubr.msk.f32.gmra.mrb[14].mxu1 %vm361_vm3, %v4857_v21  ;;  %v966_v21 = vrot.slane %v4700_v30, 2  ;;  %v334_v30 = vrot.slane %v4926_v27, 1  ;;  %5996 = vst [vmem:[#allocation29_spill] sm:$0xff] %v5030_v37 }
  0x3b   : > { %4084 = vmatmul.mubr.msk.f32.gmra.mrb[14].mxu0 %vm361_vm3, %v4881_v36  ;;  %3886 = vmatprep.mubr.msk.f32.mxu1 %vm361_vm3, %v4861_v23  ;;  %v4934_v23 = vld [vmem:[%s5893_s1 + $0x1c] sm:$0xf] }
  0x3c   : > { %4112 = vmatprep.mubr.msk.f32.mxu0 %vm361_vm3, %v4887_v39 }
  0x3e   : > { %3887 = vmatmul.mubr.msk.f32.gmra.mrb[16].mxu1 %vm361_vm3, %v4881_v36  ;;  %v4950_v36 = vsel %vm947_vm4, %v959_v55, %v961_v63  ;;  %v969_v55 = vrot.slane %v4706_v32, 2  ;;  %v4968_v63 = vld [vmem:[%s4623_s22 + $0x120] sm:$0xff] }
  0x3f   : > { %4113 = vmatmul.mubr.msk.f32.vlgmr.msra.gmra.mrb[0].mxu0 %vm361_vm3, %v4904_v56  ;;  %3889 = vmatprep.mubr.msk.f32.mxu1 %vm361_vm3, %v4920_v26  ;;  %v4983_v26 = vsel %vm947_vm4, %v964_v16, %v966_v21  ;;  %v4996_v21 = vld [vmem:[%s4623_s22 + $0x130] sm:$0x3] }
  0x40   : > { %4161 = vmatpush3.msk.msra.mxu0 %vm426_vm1, %v4751_v45  ;;  %4115 = vmatprep.mubr.msk.f32.mxu0 %vm361_vm3, %v4923_v24  ;;  %v335_v45 = vrot.slane %v4929_v34, 1  ;;  %5990 = vst [vmem:[#allocation23_spill] sm:$0xff] %v4983_v26  ;;  %v5002_v40 = vsel %vm947_vm4, %v968_v61, %v969_v55  ;;  %v976_v61 = vrot.slane %v4759_v49, 2  ;;  %v5024_v43 = vsel %vm947_vm4, %v969_v55, %v971_v60  ;;  %v5043_v60 = vld [vmem:[%s4623_s22 + $0x158] sm:$0xff] }
  0x41   : > { %4210 = vmatprep.subr.msk.mxu0 %vm426_vm1, %v4934_v23  ;;  %5992 = vst [vmem:[#allocation25_spill] sm:$0xff] %v5002_v40  ;;  %5994 = vst [vmem:[#allocation27_spill] sm:$0xff] %v5024_v43  ;;  %v345_v49 = vrot.slane %v5008_v52, 1 }
  0x42   : > { %3890 = vmatmul.mubr.msk.f32.gmra.mrb[18].mxu1 %vm361_vm3, %v4941_v14  ;;  %v339_v14 = vrot.slane %v4968_v63, 1  ;;  %v4999_v16 = vsel %vm278_vm2, %v334_v30, %v335_v45  ;;  %v5015_v46 = vsel %vm278_vm2, %v335_v45, %v337_v62  ;;  %v342_v30 = vrot.slane %v4996_v21, 1  ;;  %v5033_v62 = vld [vmem:[%s4623_s22 + $0x148] sm:$0x3] }
  0x43   : > { %4116 = vmatmul.mubr.msk.f32.gmra.mrb[2].mxu0 %vm361_vm3, %v4950_v36  ;;  %3892 = vmatprep.mubr.msk.f32.mxu1 %vm361_vm3, %v4953_v12  ;;  %5991 = vst [vmem:[#allocation24_spill] sm:$0xff] %v4999_v16  ;;  %v5005_v12 = vld [vmem:[%s4623_s22 + $0x138] sm:$0xff]  ;;  %5993 = vst [vmem:[#allocation26_spill] sm:$0xff] %v5015_v46  ;;  %v5053_v55 = vsel %vm947_vm4, %v974_v53, %v976_v61  ;;  %v347_v11 = vrot.slane %v5033_v62, 1 }
  0x44   : > { %4118 = vmatprep.mubr.msk.f32.mxu0 %vm361_vm3, %v4956_v10  ;;  %v344_v45 = vrot.slane %v5005_v12, 1  ;;  %5998 = vst [vmem:[#allocation31_spill] sm:$0xff] %v5053_v55  ;;  %v5107_v10 = vld [vmem:[%s4623_s22 + $0x178] sm:$0x3] }
  0x46   : > { %3893 = vmatmul.mubr.msk.f32.gmra.mrb[20].mxu1 %vm361_vm3, %v4980_v15  ;;  %v5027_v15 = vsel %vm278_vm2, %v339_v14, %v340_v54  ;;  %v5050_v14 = vsel %vm278_vm2, %v340_v54, %v342_v30  ;;  %v983_v54 = vrot.slane %v4790_v58, 2  ;;  %v984_v30 = vrot.slane %v4793_v59, 2 }
  0x47   : > { %4119 = vmatmul.mubr.msk.f32.gmra.mrb[4].mxu0 %vm361_vm3, %v4983_v26  ;;  %3895 = vmatprep.mubr.msk.f32.mxu1 %vm361_vm3, %v4999_v16  ;;  %5995 = vst [vmem:[#allocation28_spill] sm:$0xff] %v5027_v15  ;;  %v978_v16 = vrot.slane %v4764_v50, 2  ;;  %5997 = vst [vmem:[#allocation30_spill] sm:$0xff] %v5050_v14  ;;  %v5066_v53 = vsel %vm278_vm2, %v344_v45, %v345_v49  ;;  %v5085_v26 = vsel %vm278_vm2, %v345_v49, %v347_v11 }
  0x48   : > { %4121 = vmatprep.mubr.msk.f32.mxu0 %vm361_vm3, %v5002_v40  ;;  %v981_v40 = vrot.slane %v4787_v57, 2  ;;  %5999 = vst [vmem:[#allocation32_spill] sm:$0xff] %v5066_v53  ;;  %v5072_v57 = vld [vmem:[%s4623_s22 + $0x160] sm:$0x3]  ;;  %6002 = vst [vmem:[#allocation35_spill] sm:$0xff] %v5085_v26  ;;  %v986_v49 = vrot.slane %v4813_v1, 2 }
  0x49   : > { %v5069_v61 = vsel %vm947_vm4, %v978_v16, %v979_v35 }
  0x4a   : > { %3896 = vmatmul.mubr.msk.f32.gmra.mrb[22].mxu1 %vm361_vm3, %v5015_v46  ;;  %v349_v46 = vrot.slane %v5040_v33, 1  ;;  %6000 = vst [vmem:[#allocation33_spill] sm:$0xff] %v5069_v61  ;;  %v5088_v45 = vsel %vm947_vm4, %v979_v35, %v981_v40  ;;  %v988_v40 = vrot.slane %v4821_v6, 2  ;;  %v5121_v1 = vsel %vm947_vm4, %v984_v30, %v986_v49 }
  0x4b   : > { %4122 = vmatmul.mubr.msk.f32.gmra.mrb[6].mxu0 %vm361_vm3, %v5024_v43  ;;  %3898 = vmatprep.mubr.msk.f32.mxu1 %vm361_vm3, %v5027_v15  ;;  %v350_v43 = vrot.slane %v5043_v60, 1  ;;  %v5075_v15 = vld [vmem:[%s4623_s22 + $0x168] sm:$0xff]  ;;  %6003 = vst [vmem:[#allocation36_spill] sm:$0xff] %v5088_v45  ;;  %v998_v49 = vrot.slane %v4892_v47, 2 }
  0x4c   : > { %4124 = vmatprep.mubr.msk.f32.mxu0 %vm361_vm3, %v5030_v37  ;;  %v5078_v37 = vld [vmem:[%s4623_s22 + $0x170] sm:$0xff]  ;;  %v354_v11 = vrot.slane %v5075_v15, 1 }
  0x4d   : > { %6001 = vst [vmem:[#allocation34_spill] sm:$0xff] %v5078_v37  ;;  %v5095_v16 = vsel %vm278_vm2, %v349_v46, %v350_v43  ;;  %v355_v35 = vrot.slane %v5078_v37, 1 }
  0x4e   : > { %3899 = vmatmul.mubr.msk.f32.gmra.mrb[24].mxu1 %vm361_vm3, %v5050_v14  ;;  %6004 = vst [vmem:[#allocation37_spill] sm:$0xff] %v5095_v16  ;;  %v5098_v14 = vsel %vm947_vm4, %v983_v54, %v984_v30  ;;  %v357_v54 = vrot.slane %v5107_v10, 1 }
  0x4f   : > { %4125 = vmatmul.mubr.msk.f32.gmra.mrb[8].mxu0 %vm361_vm3, %v5053_v55  ;;  %3901 = vmatprep.mubr.msk.f32.mxu1 %vm361_vm3, %v5066_v53  ;;  %6005 = vst [vmem:[#allocation38_spill] sm:$0xff] %v5098_v14  ;;  %v352_v55 = vrot.slane %v5072_v57, 1  ;;  %v989_v53 = vrot.slane %v4824_v7, 2 }
  0x50   : > { %4127 = vmatprep.mubr.msk.f32.mxu0 %vm361_vm3, %v5069_v61  ;;  %v991_v61 = vrot.slane %v4846_v17, 2 }
  0x51   : > { %v5118_v46 = vsel %vm278_vm2, %v350_v43, %v352_v55  ;;  %v5142_v43 = vsel %vm278_vm2, %v355_v35, %v357_v54  ;;  %v996_v55 = vrot.slane %v4884_v38, 2 }
  0x52   : > { %3902 = vmatmul.mubr.msk.f32.gmra.mrb[26].mxu1 %vm361_vm3, %v5085_v26  ;;  %6006 = vst [vmem:[#allocation39_spill] sm:$0xff] %v5118_v46  ;;  %v5126_v26 = vsel %vm278_vm2, %v354_v11, %v355_v35  ;;  %6009 = vst [vmem:[#allocation42_spill] sm:$0xff] %v5142_v43  ;;  %v5145_v17 = vsel %vm947_vm4, %v989_v53, %v991_v61  ;;  %v999_v11 = vrot.slane %v4895_v48, 2  ;;  %v1003_v61 = vrot.slane %v4926_v27, 2 }
  0x53   : > { %4128 = vmatmul.mubr.msk.f32.gmra.mrb[10].mxu0 %vm361_vm3, %v5088_v45  ;;  %3904 = vmatprep.mubr.msk.f32.mxu1 %vm361_vm3, %v5095_v16  ;;  %6007 = vst [vmem:[#allocation40_spill] sm:$0xff] %v5126_v26  ;;  %v5129_v45 = vsel %vm947_vm4, %v988_v40, %v989_v53  ;;  %v993_v16 = vrot.slane %v4866_v28, 2  ;;  %v1001_v53 = vrot.slane %v4917_v22, 2  ;;  %v5173_v40 = vld [vmem:[%s5893_s1 + $0xc] sm:$0xf] }
  0x54   : > { %4130 = vmatprep.mubr.msk.f32.mxu0 %vm361_vm3, %v5098_v14  ;;  %6008 = vst [vmem:[#allocation41_spill] sm:$0xff] %v5129_v45  ;;  %v994_v14 = vrot.slane %v4869_v29, 2  ;;  %v5168_v35 = vsel %vm947_vm4, %v998_v49, %v999_v11  ;;  %v1009_v49 = vrot.slane %v4971_v0, 2 }
  0x55   : > { %v5184_v22 = vsel %vm947_vm4, %v999_v11, %v1001_v53  ;;  %v1013_v53 = vrot.slane %v5005_v12, 2 }
  0x56   : > { %3905 = vmatmul.mubr.msk.f32.gmra.mrb[28].mxu1 %vm361_vm3, %v5118_v46  ;;  %v5149_v30 = vsel %vm947_vm4, %v993_v16, %v994_v14  ;;  %v5162_v38 = vsel %vm947_vm4, %v994_v14, %v996_v55  ;;  %v1004_v16 = vrot.slane %v4929_v34, 2  ;;  %v1006_v14 = vrot.slane %v4959_v44, 2  ;;  %v5248_v46 = vld [vmem:[%s4623_s22 + $0x180] sm:$0xff] }
  0x57   : > { %4131 = vmatmul.mubr.msk.f32.gmra.mrb[12].mxu0 %vm361_vm3, %v5121_v1  ;;  %3907 = vmatprep.mubr.msk.f32.mxu1 %vm361_vm3, %v5126_v26  ;;  %v1008_v55 = vrot.slane %v4968_v63, 2  ;;  %v1011_v44 = vrot.slane %v4996_v21, 2  ;;  %v1024_v26 = vrot.slane %v5078_v37, 2 }
  0x58   : > { %4133 = vmatprep.mubr.msk.f32.mxu0 %vm361_vm3, %v5129_v45  ;;  %v5190_v54 = vsel %vm947_vm4, %v1003_v61, %v1004_v16  ;;  %v1014_v61 = vrot.slane %v5008_v52, 2 }
  0x59   : > { %v5209_v11 = vsel %vm947_vm4, %v1008_v55, %v1009_v49  ;;  %v5222_v21 = vsel %vm947_vm4, %v1009_v49, %v1011_v44  ;;  %v1018_v55 = vrot.slane %v5040_v33, 2  ;;  %v1021_v49 = vrot.slane %v5072_v57, 2 }
  0x5a   : > { %3908 = vmatmul.mubr.msk.f32.gmra.mrb[30].mxu1 %vm361_vm3, %v5142_v43  ;;  %v1019_v43 = vrot.slane %v5043_v60, 2 }
  0x5b   : > { %4134 = vmatmul.mubr.msk.f32.gmra.mrb[14].mxu0 %vm361_vm3, %v5145_v17  ;;  %3912 = vmatprep.mubr.msk.f32.mxu1 %vm361_vm3, %v4637_v3 }
  0x5c   : > { %4136 = vmatprep.mubr.msk.f32.mxu0 %vm361_vm3, %v5149_v30  ;;  %v5243_v44 = vsel %vm947_vm4, %v1018_v55, %v1019_v43  ;;  %v5262_v57 = vsel %vm947_vm4, %v1019_v43, %v1021_v49  ;;  %v1894_v55 = vrot.slane %v5248_v46, 2 }
  0x5d   : > { %6012 = vst [vmem:[#allocation45_spill] sm:$0xff] %v5243_v44  ;;  %6013 = vst [vmem:[#allocation46_spill] sm:$0xff] %v5262_v57 }
  0x5e   : > { %3913 = vmatmul.mubr.msk.f32.vlgmr.msra.gmra.mrb[0].mxu1 %vm361_vm3, %v4643_v4 }
  0x5f   : > { %4137 = vmatmul.mubr.msk.f32.gmra.mrb[16].mxu0 %vm361_vm3, %v5162_v38  ;;  %3961 = vmatpush3.msk.msra.mxu1 %vm426_vm1, %v4818_v5  ;;  %v5205_v5 = vsel %vm947_vm4, %v1004_v16, %v1006_v14  ;;  %v1016_v16 = vrot.slane %v5033_v62, 2  ;;  %v5226_v14 = vsel %vm947_vm4, %v1013_v53, %v1014_v61  ;;  %v1023_v53 = vrot.slane %v5075_v15, 2 }
  0x60   : > { %3915 = vmatprep.mubr.msk.f32.mxu1 %vm361_vm3, %v4654_v8  ;;  %4139 = vmatprep.mubr.msk.f32.mxu0 %vm361_vm3, %v5168_v35  ;;  %6010 = vst [vmem:[#allocation43_spill] sm:$0xff] %v5226_v14 }
  0x61   : > { %4010 = vmatprep.subr.msk.mxu1 %vm426_vm1, %v5173_v40  ;;  %v5239_v62 = vsel %vm947_vm4, %v1014_v61, %v1016_v16  ;;  %v1026_v61 = vrot.slane %v5107_v10, 2  ;;  %v5266_v16 = vsel %vm947_vm4, %v1023_v53, %v1024_v26  ;;  %v5310_v53 = vld [vmem:[%s5893_s1 + $0x20] sm:$0xf] }
  0x62   : > { %3916 = vmatmul.mubr.msk.f32.gmra.mrb[2].mxu1 %vm361_vm3, %v4657_v9  ;;  %6011 = vst [vmem:[#allocation44_spill] sm:$0xff] %v5239_v62  ;;  %v5251_v9 = vld [vmem:[%s4623_s22 + $0x188] sm:$0xff]  ;;  %6014 = vst [vmem:[#allocation47_spill] sm:$0xff] %v5266_v16 }
  0x63   : > { %4140 = vmatmul.mubr.msk.f32.gmra.mrb[18].mxu0 %vm361_vm3, %v5184_v22  ;;  %3918 = vmatprep.mubr.msk.f32.mxu1 %vm361_vm3, %v4676_v18  ;;  %v1895_v8 = vrot.slane %v5251_v9, 2  ;;  %v5282_v10 = vsel %vm947_vm4, %v1024_v26, %v1026_v61  ;;  %v951_v61 = vrot.slane %v4667_v13, 2  ;;  %v6019_v13 = vld [vmem:[#allocation23_spill] sm:$0xff] }
  0x64   : > { %4142 = vmatprep.mubr.msk.f32.mxu0 %vm361_vm3, %v5190_v54  ;;  %6015 = vst [vmem:[#allocation48_spill] sm:$0xff] %v5282_v10 }
  0x65   : > { %v5286_v49 = vsel %vm947_vm4, %v1894_v55, %v1895_v8 }
  0x66   : > { %3919 = vmatmul.mubr.msk.f32.gmra.mrb[4].mxu1 %vm361_vm3, %v4679_v19  ;;  %6016 = vst [vmem:[#allocation49_spill] sm:$0xff] %v5286_v49 }
  0x67   : > { %4143 = vmatmul.mubr.msk.f32.gmra.mrb[20].mxu0 %vm361_vm3, %v5205_v5  ;;  %3921 = vmatprep.mubr.msk.f32.mxu1 %vm361_vm3, %v4682_v20 }
  0x68   : > { %4145 = vmatprep.mubr.msk.f32.mxu0 %vm361_vm3, %v5209_v11 }
  0x6a   : > { %3922 = vmatmul.mubr.msk.f32.gmra.mrb[6].mxu1 %vm361_vm3, %v4692_v25 }
  0x6b   : > { %4146 = vmatmul.mubr.msk.f32.gmra.mrb[22].mxu0 %vm361_vm3, %v5222_v21  ;;  %3924 = vmatprep.mubr.msk.f32.mxu1 %vm361_vm3, %v4703_v31 }
  0x6c   : > { %4148 = vmatprep.mubr.msk.f32.mxu0 %vm361_vm3, %v5226_v14  ;;  %v5271_v14 = vld [vmem:[%s4623_s22 + $0x190] sm:$0x3] }
  0x6d   : > { %v1897_v43 = vrot.slane %v5271_v14, 2 }
  0x6e   : > { %3925 = vmatmul.mubr.msk.f32.gmra.mrb[8].mxu1 %vm361_vm3, %v4706_v32 }
  0x6f   : > { %4149 = vmatmul.mubr.msk.f32.gmra.mrb[24].mxu0 %vm361_vm3, %v5239_v62  ;;  %3927 = vmatprep.mubr.msk.f32.mxu1 %vm361_vm3, %v4732_v41  ;;  %v5297_v26 = vsel %vm947_vm4, %v1895_v8, %v1897_v43  ;;  %v948_v8 = vrot.slane %v4637_v3, 2  ;;  %v6023_v43 = vld [vmem:[#allocation31_spill] sm:$0xff] }
  0x70   : > { %4151 = vmatprep.mubr.msk.f32.mxu0 %vm361_vm3, %v5243_v44  ;;  %6017 = vst [vmem:[#allocation50_spill] sm:$0xff] %v5297_v26 }
  0x72   : > { %3928 = vmatmul.mubr.msk.f32.gmra.mrb[10].mxu1 %vm361_vm3, %v4735_v42 }
  0x73   : > { %4152 = vmatmul.mubr.msk.f32.gmra.mrb[26].mxu0 %vm361_vm3, %v5262_v57  ;;  %3930 = vmatprep.mubr.msk.f32.mxu1 %vm361_vm3, %v4764_v50 }
  0x74   : > { %4154 = vmatprep.mubr.msk.f32.mxu0 %vm361_vm3, %v5266_v16 }
  0x76   : > { %3931 = vmatmul.mubr.msk.f32.gmra.mrb[12].mxu1 %vm361_vm3, %v4767_v51 }
  0x77   : > { %4155 = vmatmul.mubr.msk.f32.gmra.mrb[28].mxu0 %vm361_vm3, %v5282_v10  ;;  %3933 = vmatprep.mubr.msk.f32.mxu1 %vm361_vm3, %v4790_v58 }
  0x78   : > { %4157 = vmatprep.mubr.msk.f32.mxu0 %vm361_vm3, %v5286_v49  ;;  %v6028_v49 = vld [vmem:[#allocation5_spill] sm:$0xff] }
  0x7a   : > { %3934 = vmatmul.mubr.msk.f32.gmra.mrb[14].mxu1 %vm361_vm3, %v4793_v59 }
  0x7b   : > { %4158 = vmatmul.mubr.msk.f32.gmra.mrb[30].mxu0 %vm361_vm3, %v5297_v26  ;;  %3936 = vmatprep.mubr.msk.f32.mxu1 %vm361_vm3, %v4821_v6  ;;  %v6027_v26 = vld [vmem:[#allocation4_spill] sm:$0xff] }
  0x7c   : > { %4162 = vmatprep.mubr.msk.f32.mxu0 %vm361_vm3, %v4676_v18 }
  0x7e   : > { %3937 = vmatmul.mubr.msk.f32.gmra.mrb[16].mxu1 %vm361_vm3, %v4824_v7 }
  0x7f   : > { %4163 = vmatmul.mubr.msk.f32.vlgmr.msra.gmra.mrb[0].mxu0 %vm361_vm3, %v4679_v19  ;;  %3939 = vmatprep.mubr.msk.f32.mxu1 %vm361_vm3, %v4866_v28 }
  0x80   : > { %4211 = vmatpush3.msk.msra.mxu0 %vm426_vm1, %v4934_v23  ;;  %4165 = vmatprep.mubr.msk.f32.mxu0 %vm361_vm3, %v4682_v20  ;;  %v949_v23 = vrot.slane %v4643_v4, 2  ;;  %v6018_v4 = vld [vmem:[#allocation21_spill] sm:$0xff] }
  0x81   : > { %4260 = vmatprep.subr.msk.mxu0 %vm426_vm1, %v5310_v53 }
  0x82   : > { %3940 = vmatmul.mubr.msk.f32.gmra.mrb[18].mxu1 %vm361_vm3, %v4869_v29  ;;  %v950_v55 = vsel %vm947_vm4, %v948_v8, %v949_v23  ;;  %v952_v3 = vsel %vm947_vm4, %v949_v23, %v951_v61  ;;  %v6024_v8 = vld [vmem:[#allocation33_spill] sm:$0xff]  ;;  %v6025_v61 = vld [vmem:[#allocation36_spill] sm:$0xff] }
  0x83   : > { %4166 = vmatmul.mubr.msk.f32.gmra.mrb[2].mxu0 %vm361_vm3, %v4692_v25  ;;  %3942 = vmatprep.mubr.msk.f32.mxu1 %vm361_vm3, %v4892_v47  ;;  %v5436_v23 = vld [vmem:[%s4623_s22 + $0x198] sm:$0xff] }
  0x84   : > { %4168 = vmatprep.mubr.msk.f32.mxu0 %vm361_vm3, %v4703_v31 }
  0x86   : > { %3943 = vmatmul.mubr.msk.f32.gmra.mrb[20].mxu1 %vm361_vm3, %v4895_v48 }
  0x87   : > { %4169 = vmatmul.mubr.msk.f32.gmra.mrb[4].mxu0 %vm361_vm3, %v4706_v32  ;;  %3945 = vmatprep.mubr.msk.f32.mxu1 %vm361_vm3, %v4926_v27 }
  0x88   : > { %4171 = vmatprep.mubr.msk.f32.mxu0 %vm361_vm3, %v4732_v41 }
  0x8a   : > { %3946 = vmatmul.mubr.msk.f32.gmra.mrb[22].mxu1 %vm361_vm3, %v4929_v34 }
  0x8b   : > { %4172 = vmatmul.mubr.msk.f32.gmra.mrb[6].mxu0 %vm361_vm3, %v4735_v42  ;;  %3948 = vmatprep.mubr.msk.f32.mxu1 %vm361_vm3, %v4968_v63 }
  0x8c   : > { %4174 = vmatprep.mubr.msk.f32.mxu0 %vm361_vm3, %v4764_v50 }
  0x8e   : > { %3949 = vmatmul.mubr.msk.f32.gmra.mrb[24].mxu1 %vm361_vm3, %v4971_v0 }
  0x8f   : > { %4175 = vmatmul.mubr.msk.f32.gmra.mrb[8].mxu0 %vm361_vm3, %v4767_v51  ;;  %3951 = vmatprep.mubr.msk.f32.mxu1 %vm361_vm3, %v5005_v12 }
  0x90   : > { %4177 = vmatprep.mubr.msk.f32.mxu0 %vm361_vm3, %v4790_v58 }
  0x92   : > { %3952 = vmatmul.mubr.msk.f32.gmra.mrb[26].mxu1 %vm361_vm3, %v5008_v52 }
  0x93   : > { %4178 = vmatmul.mubr.msk.f32.gmra.mrb[10].mxu0 %vm361_vm3, %v4793_v59  ;;  %3954 = vmatprep.mubr.msk.f32.mxu1 %vm361_vm3, %v5040_v33 }
  0x94   : > { %4180 = vmatprep.mubr.msk.f32.mxu0 %vm361_vm3, %v4821_v6 }
  0x96   : > { %3955 = vmatmul.mubr.msk.f32.gmra.mrb[28].mxu1 %vm361_vm3, %v5043_v60 }
  0x97   : > { %4181 = vmatmul.mubr.msk.f32.gmra.mrb[12].mxu0 %vm361_vm3, %v4824_v7  ;;  %3957 = vmatprep.mubr.msk.f32.mxu1 %vm361_vm3, %v5075_v15 }
  0x98   : > { %4183 = vmatprep.mubr.msk.f32.mxu0 %vm361_vm3, %v4866_v28 }
  0x9a   : > { %3958 = vmatmul.mubr.msk.f32.gmra.mrb[30].mxu1 %vm361_vm3, %v5078_v37 }
  0x9b   : > { %4184 = vmatmul.mubr.msk.f32.gmra.mrb[14].mxu0 %vm361_vm3, %v4869_v29  ;;  %3962 = vmatprep.mubr.msk.f32.mxu1 %vm361_vm3, %v950_v55  ;;  %v6026_v55 = vld [vmem:[#allocation38_spill] sm:$0xff] }
  0x9c   : > { %4186 = vmatprep.mubr.msk.f32.mxu0 %vm361_vm3, %v4892_v47 }
  0x9e   : > { %3963 = vmatmul.mubr.msk.f32.vlgmr.msra.gmra.mrb[0].mxu1 %vm361_vm3, %v952_v3  ;;  %v5447_v3 = vld [vmem:[%s4623_s22 + $0x1a0] sm:$0xff] }
  0x9f   : > { %4187 = vmatmul.mubr.msk.f32.gmra.mrb[16].mxu0 %vm361_vm3, %v4895_v48  ;;  %4011 = vmatpush3.msk.msra.mxu1 %vm426_vm1, %v5173_v40  ;;  %v6022_v40 = vld [vmem:[#allocation29_spill] sm:$0xff] }
  0xa0   : > { %3965 = vmatprep.mubr.msk.f32.mxu1 %vm361_vm3, %v4887_v39  ;;  %4189 = vmatprep.mubr.msk.f32.mxu0 %vm361_vm3, %v4926_v27  ;;  %v6020_v39 = vld [vmem:[#allocation25_spill] sm:$0xff] }
  0xa1   : > { %4310 = vmatprep.subr.msk.mxu1 %vm426_vm1, %v4634_v2 }
  0xa2   : > { %3966 = vmatmul.mubr.msk.f32.gmra.mrb[2].mxu1 %vm361_vm3, %v4904_v56  ;;  %v6021_v56 = vld [vmem:[#allocation27_spill] sm:$0xff] }
  0xa3   : > { %4190 = vmatmul.mubr.msk.f32.gmra.mrb[18].mxu0 %vm361_vm3, %v4929_v34  ;;  %3968 = vmatprep.mubr.msk.f32.mxu1 %vm361_vm3, %v4923_v24 }
  0xa4   : > { %4192 = vmatprep.mubr.msk.f32.mxu0 %vm361_vm3, %v4968_v63 }
  0xa6   : > { %3969 = vmatmul.mubr.msk.f32.gmra.mrb[4].mxu1 %vm361_vm3, %v4950_v36 }
  0xa7   : > { %4193 = vmatmul.mubr.msk.f32.gmra.mrb[20].mxu0 %vm361_vm3, %v4971_v0  ;;  %3971 = vmatprep.mubr.msk.f32.mxu1 %vm361_vm3, %v6018_v4 }
  0xa8   : > { %4195 = vmatprep.mubr.msk.f32.mxu0 %vm361_vm3, %v5005_v12 }
  0xaa   : > { %3972 = vmatmul.mubr.msk.f32.gmra.mrb[6].mxu1 %vm361_vm3, %v6019_v13 }
  0xab   : > { %4196 = vmatmul.mubr.msk.f32.gmra.mrb[22].mxu0 %vm361_vm3, %v5008_v52  ;;  %3974 = vmatprep.mubr.msk.f32.mxu1 %vm361_vm3, %v6020_v39 }
  0xac   : > { %4198 = vmatprep.mubr.msk.f32.mxu0 %vm361_vm3, %v5040_v33 }
  0xae   : > { %3975 = vmatmul.mubr.msk.f32.gmra.mrb[8].mxu1 %vm361_vm3, %v6021_v56 }
  0xaf   : > { %4199 = vmatmul.mubr.msk.f32.gmra.mrb[24].mxu0 %vm361_vm3, %v5043_v60  ;;  %3977 = vmatprep.mubr.msk.f32.mxu1 %vm361_vm3, %v6022_v40 }
  0xb0   : > { %4201 = vmatprep.mubr.msk.f32.mxu0 %vm361_vm3, %v5075_v15 }
  0xb2   : > { %3978 = vmatmul.mubr.msk.f32.gmra.mrb[10].mxu1 %vm361_vm3, %v6023_v43 }
  0xb3   : > { %4202 = vmatmul.mubr.msk.f32.gmra.mrb[26].mxu0 %vm361_vm3, %v5078_v37  ;;  %3980 = vmatprep.mubr.msk.f32.mxu1 %vm361_vm3, %v6024_v8  ;;  %v6029_v37 = vld [vmem:[#allocation6_spill] sm:$0xff] }
  0xb4   : > { %4204 = vmatprep.mubr.msk.f32.mxu0 %vm361_vm3, %v5248_v46 }
  0xb6   : > { %3981 = vmatmul.mubr.msk.f32.gmra.mrb[12].mxu1 %vm361_vm3, %v6025_v61 }
  0xb7   : > { %4205 = vmatmul.mubr.msk.f32.gmra.mrb[28].mxu0 %vm361_vm3, %v5251_v9  ;;  %3983 = vmatprep.mubr.msk.f32.mxu1 %vm361_vm3, %v6026_v55 }
  0xb8   : > { %4207 = vmatprep.mubr.msk.f32.mxu0 %vm361_vm3, %v5436_v23 }
  0xba   : > { %3984 = vmatmul.mubr.msk.f32.gmra.mrb[14].mxu1 %vm361_vm3, %v5121_v1 }
  0xbb   : > { %4208 = vmatmul.mubr.msk.f32.gmra.mrb[30].mxu0 %vm361_vm3, %v5447_v3  ;;  %3986 = vmatprep.mubr.msk.f32.mxu1 %vm361_vm3, %v5129_v45  ;;  %v6030_v45 = vld [vmem:[#allocation7_spill] sm:$0xff] }
  0xbc   : > { %4212 = vmatprep.mubr.msk.f32.mxu0 %vm361_vm3, %v6027_v26  ;;  %v6031_v26 = vld [vmem:[#allocation8_spill] sm:$0xff] }
  0xbe   : > { %3987 = vmatmul.mubr.msk.f32.gmra.mrb[16].mxu1 %vm361_vm3, %v5145_v17 }
  0xbf   : > { %4213 = vmatmul.mubr.msk.f32.vlgmr.msra.gmra.mrb[0].mxu0 %vm361_vm3, %v6028_v49  ;;  %3989 = vmatprep.mubr.msk.f32.mxu1 %vm361_vm3, %v5149_v30  ;;  %v6032_v49 = vld [vmem:[#allocation9_spill] sm:$0xff] }
  0xc0   : > { %4261 = vmatpush3.msk.msra.mxu0 %vm426_vm1, %v5310_v53  ;;  %4215 = vmatprep.mubr.msk.f32.mxu0 %vm361_vm3, %v6029_v37  ;;  %v6033_v37 = vld [vmem:[#allocation10_spill] sm:$0xff]  ;;  %v6035_v53 = vld [vmem:[#allocation12_spill] sm:$0xff] }
  0xc2   : > { %3990 = vmatmul.mubr.msk.f32.gmra.mrb[18].mxu1 %vm361_vm3, %v5162_v38 }
  0xc3   : > { %4216 = vmatmul.mubr.msk.f32.gmra.mrb[2].mxu0 %vm361_vm3, %v6030_v45  ;;  %3992 = vmatprep.mubr.msk.f32.mxu1 %vm361_vm3, %v5168_v35  ;;  %v6034_v45 = vld [vmem:[#allocation11_spill] sm:$0xff] }
  0xc4   : > { %4218 = vmatprep.mubr.msk.f32.mxu0 %vm361_vm3, %v6031_v26  ;;  %v6036_v26 = vld [vmem:[#allocation13_spill] sm:$0xff] }
  0xc6   : > { %3993 = vmatmul.mubr.msk.f32.gmra.mrb[20].mxu1 %vm361_vm3, %v5184_v22 }
  0xc7   : > { %4219 = vmatmul.mubr.msk.f32.gmra.mrb[4].mxu0 %vm361_vm3, %v6032_v49  ;;  %3995 = vmatprep.mubr.msk.f32.mxu1 %vm361_vm3, %v5190_v54  ;;  %v6037_v49 = vld [vmem:[#allocation43_spill] sm:$0xff] }
  0xc8   : > { %4221 = vmatprep.mubr.msk.f32.mxu0 %vm361_vm3, %v6033_v37  ;;  %v6038_v37 = vld [vmem:[#allocation14_spill] sm:$0xff] }
  0xca   : > { %3996 = vmatmul.mubr.msk.f32.gmra.mrb[22].mxu1 %vm361_vm3, %v5205_v5 }
  0xcb   : > { %4222 = vmatmul.mubr.msk.f32.gmra.mrb[6].mxu0 %vm361_vm3, %v6034_v45  ;;  %3998 = vmatprep.mubr.msk.f32.mxu1 %vm361_vm3, %v5209_v11  ;;  %v6039_v45 = vld [vmem:[#allocation15_spill] sm:$0xff] }
  0xcc   : > { %4224 = vmatprep.mubr.msk.f32.mxu0 %vm361_vm3, %v6035_v53  ;;  %v6040_v53 = vld [vmem:[#allocation16_spill] sm:$0xff] }
  0xce   : > { %3999 = vmatmul.mubr.msk.f32.gmra.mrb[24].mxu1 %vm361_vm3, %v5222_v21 }
  0xcf   : > { %4225 = vmatmul.mubr.msk.f32.gmra.mrb[8].mxu0 %vm361_vm3, %v6036_v26  ;;  %4001 = vmatprep.mubr.msk.f32.mxu1 %vm361_vm3, %v6037_v49  ;;  %v6041_v26 = vld [vmem:[#allocation17_spill] sm:$0xff] }
  0xd0   : > { %4227 = vmatprep.mubr.msk.f32.mxu0 %vm361_vm3, %v6038_v37  ;;  %v6042_v37 = vld [vmem:[#allocation18_spill] sm:$0xff] }
  0xd2   : > { %4002 = vmatmul.mubr.msk.f32.gmra.mrb[26].mxu1 %vm361_vm3, %v5239_v62  ;;  %v5574_v62 = vld [vmem:[%s4623_s22 + $0x1a8] sm:$0x3] }
  0xd3   : > { %4228 = vmatmul.mubr.msk.f32.gmra.mrb[10].mxu0 %vm361_vm3, %v6039_v45  ;;  %4004 = vmatprep.mubr.msk.f32.mxu1 %vm361_vm3, %v5243_v44  ;;  %v6043_v45 = vld [vmem:[#allocation19_spill] sm:$0xff]  ;;  %v6044_v44 = vld [vmem:[#allocation2_spill] sm:$0xff] }
  0xd4   : > { %4230 = vmatprep.mubr.msk.f32.mxu0 %vm361_vm3, %v6040_v53  ;;  %v6045_v53 = vld [vmem:[#allocation20_spill] sm:$0xff] }
  0xd6   : > { %4005 = vmatmul.mubr.msk.f32.gmra.mrb[28].mxu1 %vm361_vm3, %v5262_v57  ;;  %v6046_v57 = vld [vmem:[#allocation3_spill] sm:$0xff] }
  0xd7   : > { %4231 = vmatmul.mubr.msk.f32.gmra.mrb[12].mxu0 %vm361_vm3, %v6041_v26  ;;  %4007 = vmatprep.mubr.msk.f32.mxu1 %vm361_vm3, %v5266_v16  ;;  %v6047_v26 = vld [vmem:[#allocation22_spill] sm:$0xff]  ;;  %v6055_v16 = vld [vmem:[#allocation39_spill] sm:$0xff] }
  0xd8   : > { %4233 = vmatprep.mubr.msk.f32.mxu0 %vm361_vm3, %v6042_v37 }
  0xda   : > { %4008 = vmatmul.mubr.msk.f32.gmra.mrb[30].mxu1 %vm361_vm3, %v5282_v10  ;;  %v6048_v10 = vld [vmem:[#allocation24_spill] sm:$0xff] }
  0xdb   : > { %4234 = vmatmul.mubr.msk.f32.gmra.mrb[14].mxu0 %vm361_vm3, %v6043_v45  ;;  %4012 = vmatprep.mubr.msk.f32.mxu1 %vm361_vm3, %v6044_v44  ;;  %v6049_v44 = vld [vmem:[#allocation26_spill] sm:$0xff] }
  0xdc   : > { %4236 = vmatprep.mubr.msk.f32.mxu0 %vm361_vm3, %v6045_v53 }
  0xde   : > { %4013 = vmatmul.mubr.msk.f32.vlgmr.msra.gmra.mrb[0].mxu1 %vm361_vm3, %v6046_v57  ;;  %v6050_v57 = vld [vmem:[#allocation28_spill] sm:$0xff] }
  0xdf   : > { %4237 = vmatmul.mubr.msk.f32.gmra.mrb[16].mxu0 %vm361_vm3, %v6047_v26  ;;  %4311 = vmatpush3.msk.msra.mxu1 %vm426_vm1, %v4634_v2  ;;  %v6051_v2 = vld [vmem:[#allocation30_spill] sm:$0xff] }
  0xe0   : > { %4015 = vmatprep.mubr.msk.f32.mxu1 %vm361_vm3, %v4676_v18  ;;  %4239 = vmatprep.mubr.msk.f32.mxu0 %vm361_vm3, %v6048_v10  ;;  %v6052_v18 = vld [vmem:[#allocation32_spill] sm:$0xff] }
  0xe2   : > { %4016 = vmatmul.mubr.msk.f32.gmra.mrb[2].mxu1 %vm361_vm3, %v4679_v19  ;;  %v6053_v19 = vld [vmem:[#allocation35_spill] sm:$0xff] }
  0xe3   : > { %4240 = vmatmul.mubr.msk.f32.gmra.mrb[18].mxu0 %vm361_vm3, %v6049_v44  ;;  %4018 = vmatprep.mubr.msk.f32.mxu1 %vm361_vm3, %v4682_v20  ;;  %v6054_v20 = vld [vmem:[#allocation37_spill] sm:$0xff] }
  0xe4   : > { %4242 = vmatprep.mubr.msk.f32.mxu0 %vm361_vm3, %v6050_v57 }
  0xe6   : > { %4019 = vmatmul.mubr.msk.f32.gmra.mrb[4].mxu1 %vm361_vm3, %v4692_v25  ;;  %v1623_v25 = vrot.slane %v5248_v46, 1 }
  0xe7   : > { %4243 = vmatmul.mubr.msk.f32.gmra.mrb[20].mxu0 %vm361_vm3, %v6051_v2  ;;  %4021 = vmatprep.mubr.msk.f32.mxu1 %vm361_vm3, %v4703_v31  ;;  %v1624_v31 = vrot.slane %v5251_v9, 1 }
  0xe8   : > { %4245 = vmatprep.mubr.msk.f32.mxu0 %vm361_vm3, %v6052_v18 }
  0xe9   : > { %v5571_v18 = vsel %vm278_vm2, %v1623_v25, %v1624_v31 }
  0xea   : > { %4022 = vmatmul.mubr.msk.f32.gmra.mrb[6].mxu1 %vm361_vm3, %v4706_v32  ;;  %v6056_v32 = vld [vmem:[#allocation40_spill] sm:$0xff] }
  0xeb   : > { %4246 = vmatmul.mubr.msk.f32.gmra.mrb[22].mxu0 %vm361_vm3, %v6053_v19  ;;  %4024 = vmatprep.mubr.msk.f32.mxu1 %vm361_vm3, %v4732_v41  ;;  %v1626_v41 = vrot.slane %v5271_v14, 1  ;;  %v2435_v19 = vrot.slane %v5447_v3, 1  ;;  %v2437_v14 = vrot.slane %v5574_v62, 1 }
  0xec   : > { %4248 = vmatprep.mubr.msk.f32.mxu0 %vm361_vm3, %v6054_v20  ;;  %v2434_v20 = vrot.slane %v5436_v23, 1 }
  0xee   : > { %4025 = vmatmul.mubr.msk.f32.gmra.mrb[8].mxu1 %vm361_vm3, %v4735_v42  ;;  %v6057_v42 = vld [vmem:[#allocation42_spill] sm:$0xff]  ;;  %v2436_v25 = vsel %vm278_vm2, %v2434_v20, %v2435_v19 }
  0xef   : > { %4249 = vmatmul.mubr.msk.f32.gmra.mrb[24].mxu0 %vm361_vm3, %v6055_v16  ;;  %4027 = vmatprep.mubr.msk.f32.mxu1 %vm361_vm3, %v4764_v50  ;;  %v5585_v50 = vsel %vm278_vm2, %v1624_v31, %v1626_v41 }
  0xf0   : > { %4251 = vmatprep.mubr.msk.f32.mxu0 %vm361_vm3, %v6056_v32 }
  0xf2   : > { %4028 = vmatmul.mubr.msk.f32.gmra.mrb[10].mxu1 %vm361_vm3, %v4767_v51  ;;  %v2438_v51 = vsel %vm278_vm2, %v2435_v19, %v2437_v14 }
  0xf3   : > { %4252 = vmatmul.mubr.msk.f32.gmra.mrb[26].mxu0 %vm361_vm3, %v6057_v42  ;;  %4030 = vmatprep.mubr.msk.f32.mxu1 %vm361_vm3, %v4790_v58  ;;  %v6058_v58 = vld [vmem:[#allocation41_spill] sm:$0xff] }
  0xf4   : > { %4254 = vmatprep.mubr.msk.f32.mxu0 %vm361_vm3, %v5571_v18 }
  0xf6   : > { %4031 = vmatmul.mubr.msk.f32.gmra.mrb[12].mxu1 %vm361_vm3, %v4793_v59  ;;  %v6062_v59 = vld [vmem:[#allocation45_spill] sm:$0xff] }
  0xf7   : > { %4255 = vmatmul.mubr.msk.f32.gmra.mrb[28].mxu0 %vm361_vm3, %v5585_v50  ;;  %4033 = vmatprep.mubr.msk.f32.mxu1 %vm361_vm3, %v4821_v6  ;;  %v6063_v6 = vld [vmem:[#allocation35_spill] sm:$0xff] }
  0xf8   : > { %4257 = vmatprep.mubr.msk.f32.mxu0 %vm361_vm3, %v2436_v25 }
  0xfa   : > { %4034 = vmatmul.mubr.msk.f32.gmra.mrb[14].mxu1 %vm361_vm3, %v4824_v7  ;;  %v6064_v7 = vld [vmem:[#allocation46_spill] sm:$0xff] }
  0xfb   : > { %4258 = vmatmul.mubr.msk.f32.gmra.mrb[30].mxu0 %vm361_vm3, %v2438_v51  ;;  %4036 = vmatprep.mubr.msk.f32.mxu1 %vm361_vm3, %v4866_v28  ;;  %v6066_v28 = vld [vmem:[#allocation47_spill] sm:$0xff] }
  0xfc   : > { %4262 = vmatprep.mubr.msk.f32.mxu0 %vm361_vm3, %v4923_v24  ;;  %v2708_v24 = vrot.slane %v5574_v62, 2 }
  0xfe   : > { %4037 = vmatmul.mubr.msk.f32.gmra.mrb[16].mxu1 %vm361_vm3, %v4869_v29  ;;  %v2705_v29 = vrot.slane %v5436_v23, 2 }
  0xff   : > { %4263 = vmatmul.mubr.msk.f32.vlgmr.msra.gmra.mrb[0].mxu0 %vm361_vm3, %v4950_v36  ;;  %4039 = vmatprep.mubr.msk.f32.mxu1 %vm361_vm3, %v4892_v47  ;;  %v2706_v36 = vrot.slane %v5447_v3, 2  ;;  %v6067_v47 = vld [vmem:[#allocation48_spill] sm:$0xff] }
 0x100   : > { %4265 = vmatprep.mubr.msk.f32.mxu0 %vm361_vm3, %v6018_v4 }
 0x102   : > { %4040 = vmatmul.mubr.msk.f32.gmra.mrb[18].mxu1 %vm361_vm3, %v4895_v48  ;;  %v6068_v48 = vld [vmem:[#allocation49_spill] sm:$0xff] }
 0x103   : > { %4266 = vmatmul.mubr.msk.f32.gmra.mrb[2].mxu0 %vm361_vm3, %v6019_v13  ;;  %4042 = vmatprep.mubr.msk.f32.mxu1 %vm361_vm3, %v4926_v27  ;;  %v2707_v27 = vsel %vm947_vm4, %v2705_v29, %v2706_v36 }
 0x104   : > { %4268 = vmatprep.mubr.msk.f32.mxu0 %vm361_vm3, %v6020_v39 }
 0x106   : > { %4043 = vmatmul.mubr.msk.f32.gmra.mrb[20].mxu1 %vm361_vm3, %v4929_v34  ;;  %v6069_v34 = vld [vmem:[#allocation50_spill] sm:$0xff] }
 0x107   : > { %4269 = vmatmul.mubr.msk.f32.gmra.mrb[4].mxu0 %vm361_vm3, %v6021_v56  ;;  %4045 = vmatprep.mubr.msk.f32.mxu1 %vm361_vm3, %v4968_v63  ;;  %v2709_v63 = vsel %vm947_vm4, %v2706_v36, %v2708_v24 }
 0x108   : > { %4271 = vmatprep.mubr.msk.f32.mxu0 %vm361_vm3, %v6022_v40 }
 0x10a   : > { %4046 = vmatmul.mubr.msk.f32.gmra.mrb[22].mxu1 %vm361_vm3, %v4971_v0 }
 0x10b   : > { %4272 = vmatmul.mubr.msk.f32.gmra.mrb[6].mxu0 %vm361_vm3, %v6023_v43  ;;  %4048 = vmatprep.mubr.msk.f32.mxu1 %vm361_vm3, %v5005_v12  ;;  %v6065_v12 = vld [vmem:[#allocation37_spill] sm:$0xff] }
 0x10c   : > { %4274 = vmatprep.mubr.msk.f32.mxu0 %vm361_vm3, %v6024_v8 }
 0x10e   : > { %4049 = vmatmul.mubr.msk.f32.gmra.mrb[24].mxu1 %vm361_vm3, %v5008_v52  ;;  %v6059_v52 = vld [vmem:[#allocation34_spill] sm:$0xff] }
 0x10f   : > { %4275 = vmatmul.mubr.msk.f32.gmra.mrb[8].mxu0 %vm361_vm3, %v6025_v61  ;;  %4051 = vmatprep.mubr.msk.f32.mxu1 %vm361_vm3, %v5040_v33  ;;  %v6061_v33 = vld [vmem:[#allocation32_spill] sm:$0xff] }
 0x110   : > { %4277 = vmatprep.mubr.msk.f32.mxu0 %vm361_vm3, %v6026_v55 }
 0x112   : > { %4052 = vmatmul.mubr.msk.f32.gmra.mrb[26].mxu1 %vm361_vm3, %v5043_v60 }
 0x113   : > { %4278 = vmatmul.mubr.msk.f32.gmra.mrb[10].mxu0 %vm361_vm3, %v5121_v1  ;;  %4054 = vmatprep.mubr.msk.f32.mxu1 %vm361_vm3, %v5075_v15 }
 0x114   : > { %4280 = vmatprep.mubr.msk.f32.mxu0 %vm361_vm3, %v6058_v58 }
 0x116   : > { %4055 = vmatmul.mubr.msk.f32.gmra.mrb[28].mxu1 %vm361_vm3, %v6059_v52 }
 0x117   : > { %4281 = vmatmul.mubr.msk.f32.gmra.mrb[12].mxu0 %vm361_vm3, %v5145_v17  ;;  %4057 = vmatprep.mubr.msk.f32.mxu1 %vm361_vm3, %v5248_v46 }
 0x118   : > { %4283 = vmatprep.mubr.msk.f32.mxu0 %vm361_vm3, %v5149_v30 }
 0x11a   : > { %4058 = vmatmul.mubr.msk.f32.gmra.mrb[30].mxu1 %vm361_vm3, %v5251_v9  ;;  %v6060_v9 = vld [vmem:[#allocation44_spill] sm:$0xff] }
 0x11b   : > { %4284 = vmatmul.mubr.msk.f32.gmra.mrb[14].mxu0 %vm361_vm3, %v5162_v38  ;;  %4086 = vmatprep.mubr.msk.f32.mxu1 %vm361_vm3, %v6042_v37 }
 0x11c   : > { %4286 = vmatprep.mubr.msk.f32.mxu0 %vm361_vm3, %v5168_v35 }
 0x11e   : > { %4087 = vmatmul.mubr.msk.f32.vlgmr.msra.gmra.mrb[16].mxu1 %vm361_vm3, %v6043_v45 }
 0x11f   : > { %4287 = vmatmul.mubr.msk.f32.gmra.mrb[16].mxu0 %vm361_vm3, %v5184_v22  ;;  %4089 = vmatprep.mubr.msk.f32.mxu1 %vm361_vm3, %v6045_v53 }
 0x120   : > { %4289 = vmatprep.mubr.msk.f32.mxu0 %vm361_vm3, %v5190_v54 }
 0x122   : > { %4090 = vmatmul.mubr.msk.f32.gmra.mrb[18].mxu1 %vm361_vm3, %v6047_v26 }
 0x123   : > { %4290 = vmatmul.mubr.msk.f32.gmra.mrb[18].mxu0 %vm361_vm3, %v5205_v5  ;;  %4092 = vmatprep.mubr.msk.f32.mxu1 %vm361_vm3, %v6048_v10 }
 0x124   : > { %4292 = vmatprep.mubr.msk.f32.mxu0 %vm361_vm3, %v5209_v11 }
 0x126   : > { %4093 = vmatmul.mubr.msk.f32.gmra.mrb[20].mxu1 %vm361_vm3, %v6049_v44 }
 0x127   : > { %4293 = vmatmul.mubr.msk.f32.gmra.mrb[20].mxu0 %vm361_vm3, %v5222_v21  ;;  %4095 = vmatprep.mubr.msk.f32.mxu1 %vm361_vm3, %v6050_v57 }
 0x128   : > { %4295 = vmatprep.mubr.msk.f32.mxu0 %vm361_vm3, %v6037_v49 }
 0x12a   : > { %4096 = vmatmul.mubr.msk.f32.gmra.mrb[22].mxu1 %vm361_vm3, %v6051_v2 }
 0x12b   : > { %4296 = vmatmul.mubr.msk.f32.gmra.mrb[22].mxu0 %vm361_vm3, %v6060_v9  ;;  %4098 = vmatprep.mubr.msk.f32.mxu1 %vm361_vm3, %v6061_v33 }
 0x12c   : > { %4298 = vmatprep.mubr.msk.f32.mxu0 %vm361_vm3, %v6062_v59 }
 0x12e   : > { %4099 = vmatmul.mubr.msk.f32.gmra.mrb[24].mxu1 %vm361_vm3, %v6063_v6 }
 0x12f   : > { %4299 = vmatmul.mubr.msk.f32.gmra.mrb[24].mxu0 %vm361_vm3, %v6064_v7  ;;  %4101 = vmatprep.mubr.msk.f32.mxu1 %vm361_vm3, %v6065_v12 }
 0x130   : > { %4301 = vmatprep.mubr.msk.f32.mxu0 %vm361_vm3, %v6066_v28 }
 0x132   : > { %4102 = vmatmul.mubr.msk.f32.gmra.mrb[26].mxu1 %vm361_vm3, %v6055_v16 }
 0x133   : > { %4302 = vmatmul.mubr.msk.f32.gmra.mrb[26].mxu0 %vm361_vm3, %v6067_v47  ;;  %4104 = vmatprep.mubr.msk.f32.mxu1 %vm361_vm3, %v6056_v32 }
 0x134   : > { %4304 = vmatprep.mubr.msk.f32.mxu0 %vm361_vm3, %v6068_v48 }
 0x136   : > { %4105 = vmatmul.mubr.msk.f32.gmra.mrb[28].mxu1 %vm361_vm3, %v6057_v42 }
 0x137   : > { %4305 = vmatmul.mubr.msk.f32.gmra.mrb[28].mxu0 %vm361_vm3, %v6069_v34  ;;  %4107 = vmatprep.mubr.msk.f32.mxu1 %vm361_vm3, %v5571_v18 }
 0x138   : > { %4307 = vmatprep.mubr.msk.f32.mxu0 %vm361_vm3, %v2707_v27 }
 0x13a   : > { %4108 = vmatmul.mubr.msk.f32.gmra.mrb[30].mxu1 %vm361_vm3, %v5585_v50 }
 0x13b   : > { %4308 = vmatmul.mubr.msk.f32.gmra.mrb[30].mxu0 %vm361_vm3, %v2709_v63 }
 0x1b1   : > { %v4014_v0 = vpop.f32.mrb[0].mxu1 }
 0x1b2   : > { %v1431_v15 = vpop.f32.mrb[1].mxu1 }
 0x1b5   : > { %v4017_v60 = vpop.f32.mrb[2].mxu1 }
 0x1b6   : > { %v1441_v46 = vpop.f32.mrb[3].mxu1 }
 0x1b9   : > { %v4020_v1 = vpop.f32.mrb[4].mxu1 }
 0x1ba   : > { %v1451_v17 = vpop.f32.mrb[5].mxu1 }
 0x1bd   : > { %v4023_v30 = vpop.f32.mrb[6].mxu1 }
 0x1be   : > { %v1461_v38 = vpop.f32.mrb[7].mxu1 }
 0x1c1   : > { %v5731_v35 = vpop.f32.mrb[8].mxu1 }
 0x1c2   : > { %v5733_v22 = vpop.f32.mrb[9].mxu1 }
 0x1c5   : > { %v5735_v54 = vpop.f32.mrb[10].mxu1 }
 0x1c6   : > { %v5737_v5 = vpop.f32.mrb[11].mxu1 }
 0x1c9   : > { %v5739_v11 = vpop.f32.mrb[12].mxu1 }
 0x1ca   : > { %v5741_v21 = vpop.f32.mrb[13].mxu1 }
 0x1cd   : > { %v5743_v62 = vpop.f32.mrb[14].mxu1 }
 0x1ce   : > { %v5745_v16 = vpop.f32.mrb[15].mxu1 }
 0x1d2   : > { %v4264_v10 = vpop.f32.mrb[0].mxu0 }
 0x1d3   : > { %v4312_v4 = vadd.f32 %v4264_v10, %v4014_v0  ;;  %v2785_v13 = vpop.f32.mrb[1].mxu0 }
 0x1d4   : > { %v4313_v39 = vadd.f32 %v2785_v13, %v1431_v15 }
 0x1d5   : > { %2978 = vst.msk [vmem:[%s4618_s19 + $0x8] sm:$0xff] %vm2976_vm5, %v4312_v4  ;;  %v3010_v56 = vsel %vm2976_vm5, %v4312_v4, 0.0  ;;  %v3079_v40 = vmul.f32 %v4312_v4, %v4312_v4 }
 0x1d6   : > { %2977 = vst.msk [vmem:[%s4618_s19] sm:$0xff] %vm2976_vm5, %v4313_v39  ;;  %v3009_v43 = vsel %vm2976_vm5, %v4313_v39, 0.0  ;;  %v3078_v8 = vmul.f32 %v4313_v39, %v4313_v39  ;;  %v4267_v23 = vpop.f32.mrb[2].mxu0 }
 0x1d7   : > { %v3111_v61 = vsel %vm2976_vm5, %v3079_v40, 0.0  ;;  %v3011_v55 = vadd.f32 %v3010_v56, %v3009_v43  ;;  %v4314_v3 = vadd.f32 %v4267_v23, %v4017_v60  ;;  %v2795_v49 = vpop.f32.mrb[3].mxu0 }
 0x1d8   : > { %v3110_v37 = vsel %vm2976_vm5, %v3078_v8, 0.0  ;;  %v4315_v45 = vadd.f32 %v2795_v49, %v1441_v46 }
 0x1d9   : > { %v3112_v53 = vadd.f32 %v3111_v61, %v3110_v37  ;;  %2980 = vst.msk [vmem:[%s4618_s19 + $0x18] sm:$0xff] %vm2976_vm5, %v4314_v3  ;;  %v3081_v26 = vmul.f32 %v4314_v3, %v4314_v3  ;;  %v3014_v31 = vsel %vm2976_vm5, %v4314_v3, 0.0 }
 0x1da   : > { %2979 = vst.msk [vmem:[%s4618_s19 + $0x10] sm:$0xff] %vm2976_vm5, %v4315_v45  ;;  %v3012_v44 = vsel %vm2976_vm5, %v4315_v45, 0.0  ;;  %v3080_v57 = vmul.f32 %v4315_v45, %v4315_v45  ;;  %v4270_v2 = vpop.f32.mrb[4].mxu0 }
 0x1db   : > { %v3013_v18 = vadd.f32 %v3012_v44, %v3011_v55  ;;  %v4316_v19 = vadd.f32 %v4270_v2, %v4020_v1  ;;  %v2805_v20 = vpop.f32.mrb[5].mxu0  ;;  %v3115_v14 = vsel %vm2976_vm5, %v3081_v26, 0.0 }
 0x1dc   : > { %v3113_v32 = vsel %vm2976_vm5, %v3080_v57, 0.0  ;;  %v4317_v41 = vadd.f32 %v2805_v20, %v1451_v17 }
 0x1dd   : > { %v3114_v42 = vadd.f32 %v3113_v32, %v3112_v53  ;;  %2982 = vst.msk [vmem:[%s4618_s19 + $0x28] sm:$0xff] %vm2976_vm5, %v4316_v19  ;;  %v3015_v50 = vadd.f32 %v3014_v31, %v3013_v18  ;;  %v3083_v25 = vmul.f32 %v4316_v19, %v4316_v19  ;;  %v3018_v7 = vsel %vm2976_vm5, %v4316_v19, 0.0 }
 0x1de   : > { %2981 = vst.msk [vmem:[%s4618_s19 + $0x20] sm:$0xff] %vm2976_vm5, %v4317_v41  ;;  %v3016_v51 = vsel %vm2976_vm5, %v4317_v41, 0.0  ;;  %v3082_v58 = vmul.f32 %v4317_v41, %v4317_v41  ;;  %v4273_v52 = vpop.f32.mrb[6].mxu0 }
 0x1df   : > { %v3017_v9 = vadd.f32 %v3016_v51, %v3015_v50  ;;  %v3116_v33 = vadd.f32 %v3115_v14, %v3114_v42  ;;  %v4318_v59 = vadd.f32 %v4273_v52, %v4023_v30  ;;  %v2815_v6 = vpop.f32.mrb[7].mxu0  ;;  %v3119_v47 = vsel %vm2976_vm5, %v3083_v25, 0.0 }
 0x1e0   : > { %v3117_v12 = vsel %vm2976_vm5, %v3082_v58, 0.0  ;;  %v4319_v28 = vadd.f32 %v2815_v6, %v1461_v38 }
 0x1e1   : > { %v3118_v29 = vadd.f32 %v3117_v12, %v3116_v33  ;;  %2984 = vst.msk [vmem:[%s4618_s19 + $0x38] sm:$0xff] %vm2976_vm5, %v4318_v59  ;;  %v3019_v36 = vadd.f32 %v3018_v7, %v3017_v9  ;;  %v3085_v48 = vmul.f32 %v4318_v59, %v4318_v59  ;;  %v3022_v46 = vsel %vm2976_vm5, %v4318_v59, 0.0 }
 0x1e2   : > { %2983 = vst.msk [vmem:[%s4618_s19 + $0x30] sm:$0xff] %vm2976_vm5, %v4319_v28  ;;  %v3020_v24 = vsel %vm2976_vm5, %v4319_v28, 0.0  ;;  %v3084_v27 = vmul.f32 %v4319_v28, %v4319_v28  ;;  %v4276_v34 = vpop.f32.mrb[8].mxu0 }
 0x1e3   : > { %v3021_v63 = vadd.f32 %v3020_v24, %v3019_v36  ;;  %v3120_v0 = vadd.f32 %v3119_v47, %v3118_v29  ;;  %v4320_v15 = vadd.f32 %v4276_v34, %v5731_v35  ;;  %v2825_v60 = vpop.f32.mrb[9].mxu0  ;;  %v3123_v10 = vsel %vm2976_vm5, %v3085_v48, 0.0 }
 0x1e4   : > { %v3121_v1 = vsel %vm2976_vm5, %v3084_v27, 0.0  ;;  %v4321_v17 = vadd.f32 %v2825_v60, %v5733_v22 }
 0x1e5   : > { %v3122_v30 = vadd.f32 %v3121_v1, %v3120_v0  ;;  %2986 = vst.msk [vmem:[%s4618_s19 + $0x48] sm:$0xff] %vm2976_vm5, %v4320_v15  ;;  %v3023_v38 = vadd.f32 %v3022_v46, %v3021_v63  ;;  %v3087_v4 = vmul.f32 %v4320_v15, %v4320_v15  ;;  %v3026_v8 = vsel %vm2976_vm5, %v4320_v15, 0.0 }
 0x1e6   : > { %2985 = vst.msk [vmem:[%s4618_s19 + $0x40] sm:$0xff] %vm2976_vm5, %v4321_v17  ;;  %v3024_v35 = vsel %vm2976_vm5, %v4321_v17, 0.0  ;;  %v3086_v13 = vmul.f32 %v4321_v17, %v4321_v17  ;;  %v4279_v39 = vpop.f32.mrb[10].mxu0 }
 0x1e7   : > { %v3025_v56 = vadd.f32 %v3024_v35, %v3023_v38  ;;  %v3124_v40 = vadd.f32 %v3123_v10, %v3122_v30  ;;  %v4322_v43 = vadd.f32 %v4279_v39, %v5735_v54  ;;  %v2835_v22 = vpop.f32.mrb[11].mxu0  ;;  %v3127_v49 = vsel %vm2976_vm5, %v3087_v4, 0.0 }
 0x1e8   : > { %v3125_v23 = vsel %vm2976_vm5, %v3086_v13, 0.0  ;;  %v4323_v61 = vadd.f32 %v2835_v22, %v5737_v5 }
 0x1e9   : > { %v3126_v55 = vadd.f32 %v3125_v23, %v3124_v40  ;;  %2988 = vst.msk [vmem:[%s4618_s19 + $0x58] sm:$0xff] %vm2976_vm5, %v4322_v43  ;;  %v3027_v3 = vadd.f32 %v3026_v8, %v3025_v56  ;;  %v3089_v37 = vmul.f32 %v4322_v43, %v4322_v43  ;;  %v3030_v2 = vsel %vm2976_vm5, %v4322_v43, 0.0 }
 0x1ea   : > { %2987 = vst.msk [vmem:[%s4618_s19 + $0x50] sm:$0xff] %vm2976_vm5, %v4323_v61  ;;  %v3028_v54 = vsel %vm2976_vm5, %v4323_v61, 0.0  ;;  %v3088_v45 = vmul.f32 %v4323_v61, %v4323_v61  ;;  %v4282_v53 = vpop.f32.mrb[12].mxu0 }
 0x1eb   : > { %v3029_v26 = vadd.f32 %v3028_v54, %v3027_v3  ;;  %v3128_v44 = vadd.f32 %v3127_v49, %v3126_v55  ;;  %v4324_v57 = vadd.f32 %v4282_v53, %v5739_v11  ;;  %v2845_v5 = vpop.f32.mrb[13].mxu0  ;;  %v3131_v32 = vsel %vm2976_vm5, %v3089_v37, 0.0 }
 0x1ec   : > { %v3129_v18 = vsel %vm2976_vm5, %v3088_v45, 0.0  ;;  %v4325_v19 = vadd.f32 %v2845_v5, %v5741_v21 }
 0x1ed   : > { %v3130_v20 = vadd.f32 %v3129_v18, %v3128_v44  ;;  %2990 = vst.msk [vmem:[%s4618_s19 + $0x68] sm:$0xff] %vm2976_vm5, %v4324_v57  ;;  %v3031_v31 = vadd.f32 %v3030_v2, %v3029_v26  ;;  %v3091_v41 = vmul.f32 %v4324_v57, %v4324_v57  ;;  %v3034_v58 = vsel %vm2976_vm5, %v4324_v57, 0.0 }
 0x1ee   : > { %2989 = vst.msk [vmem:[%s4618_s19 + $0x60] sm:$0xff] %vm2976_vm5, %v4325_v19  ;;  %v3032_v11 = vsel %vm2976_vm5, %v4325_v19, 0.0  ;;  %v3090_v42 = vmul.f32 %v4325_v19, %v4325_v19  ;;  %v4285_v50 = vpop.f32.mrb[14].mxu0 }
 0x1ef   : > { %v3033_v14 = vadd.f32 %v3032_v11, %v3031_v31  ;;  %v3132_v25 = vadd.f32 %v3131_v32, %v3130_v20  ;;  %v4326_v51 = vadd.f32 %v4285_v50, %v5743_v62  ;;  %v2855_v21 = vpop.f32.mrb[15].mxu0  ;;  %v3135_v6 = vsel %vm2976_vm5, %v3091_v41, 0.0 }
 0x1f0   : > { %v3133_v52 = vsel %vm2976_vm5, %v3090_v42, 0.0  ;;  %v4327_v9 = vadd.f32 %v2855_v21, %v5745_v16 }
 0x1f1   : > { %v3134_v33 = vadd.f32 %v3133_v52, %v3132_v25  ;;  %2992 = vst.msk [vmem:[%s4618_s19 + $0x78] sm:$0xff] %vm2976_vm5, %v4326_v51  ;;  %v3035_v59 = vadd.f32 %v3034_v58, %v3033_v14  ;;  %v3093_v7 = vmul.f32 %v4326_v51, %v4326_v51  ;;  %v4088_v28 = vpop.f32.mrb[16].mxu1  ;;  %v3038_v27 = vsel %vm2976_vm5, %v4326_v51, 0.0 }
 0x1f2   : > { %2991 = vst.msk [vmem:[%s4618_s19 + $0x70] sm:$0xff] %vm2976_vm5, %v4327_v9  ;;  %v3036_v12 = vsel %vm2976_vm5, %v4327_v9, 0.0  ;;  %v3092_v62 = vmul.f32 %v4327_v9, %v4327_v9  ;;  %v4288_v29 = vpop.f32.mrb[16].mxu0  ;;  %v1783_v16 = vpop.f32.mrb[17].mxu1 }
 0x1f3   : > { %v3037_v36 = vadd.f32 %v3036_v12, %v3035_v59  ;;  %v3136_v47 = vadd.f32 %v3135_v6, %v3134_v33  ;;  %v4328_v48 = vadd.f32 %v4288_v29, %v4088_v28  ;;  %v2865_v24 = vpop.f32.mrb[17].mxu0  ;;  %v3139_v60 = vsel %vm2976_vm5, %v3093_v7, 0.0 }
 0x1f4   : > { %v3137_v34 = vsel %vm2976_vm5, %v3092_v62, 0.0  ;;  %v4329_v63 = vadd.f32 %v2865_v24, %v1783_v16 }
 0x1f5   : > { %v3138_v0 = vadd.f32 %v3137_v34, %v3136_v47  ;;  %2994 = vst.msk [vmem:[%s4618_s19 + $0x88] sm:$0xff] %vm2976_vm5, %v4328_v48  ;;  %v3039_v15 = vadd.f32 %v3038_v27, %v3037_v36  ;;  %v3095_v46 = vmul.f32 %v4328_v48, %v4328_v48  ;;  %v4091_v30 = vpop.f32.mrb[18].mxu1  ;;  %v3042_v56 = vsel %vm2976_vm5, %v4328_v48, 0.0 }
 0x1f6   : > { %2993 = vst.msk [vmem:[%s4618_s19 + $0x80] sm:$0xff] %vm2976_vm5, %v4329_v63  ;;  %v3040_v1 = vsel %vm2976_vm5, %v4329_v63, 0.0  ;;  %v3094_v17 = vmul.f32 %v4329_v63, %v4329_v63  ;;  %v4291_v38 = vpop.f32.mrb[18].mxu0  ;;  %v1793_v13 = vpop.f32.mrb[19].mxu1 }
 0x1f7   : > { %v3041_v10 = vadd.f32 %v3040_v1, %v3039_v15  ;;  %v3140_v4 = vadd.f32 %v3139_v60, %v3138_v0  ;;  %v4330_v35 = vadd.f32 %v4291_v38, %v4091_v30  ;;  %v2875_v39 = vpop.f32.mrb[19].mxu0  ;;  %v3143_v23 = vsel %vm2976_vm5, %v3095_v46, 0.0 }
 0x1f8   : > { %v3141_v40 = vsel %vm2976_vm5, %v3094_v17, 0.0  ;;  %v4331_v43 = vadd.f32 %v2875_v39, %v1793_v13 }
 0x1f9   : > { %v3142_v22 = vadd.f32 %v3141_v40, %v3140_v4  ;;  %2996 = vst.msk [vmem:[%s4618_s19 + $0x98] sm:$0xff] %vm2976_vm5, %v4330_v35  ;;  %v3043_v8 = vadd.f32 %v3042_v56, %v3041_v10  ;;  %v3097_v61 = vmul.f32 %v4330_v35, %v4330_v35  ;;  %v4094_v49 = vpop.f32.mrb[20].mxu1  ;;  %v3046_v57 = vsel %vm2976_vm5, %v4330_v35, 0.0 }
 0x1fa   : > { %2995 = vst.msk [vmem:[%s4618_s19 + $0x90] sm:$0xff] %vm2976_vm5, %v4331_v43  ;;  %v3044_v55 = vsel %vm2976_vm5, %v4331_v43, 0.0  ;;  %v3096_v3 = vmul.f32 %v4331_v43, %v4331_v43  ;;  %v4294_v37 = vpop.f32.mrb[20].mxu0  ;;  %v1803_v26 = vpop.f32.mrb[21].mxu1 }
 0x1fb   : > { %v3045_v54 = vadd.f32 %v3044_v55, %v3043_v8  ;;  %v3144_v45 = vadd.f32 %v3143_v23, %v3142_v22  ;;  %v4332_v53 = vadd.f32 %v4294_v37, %v4094_v49  ;;  %v2885_v44 = vpop.f32.mrb[21].mxu0  ;;  %v3147_v20 = vsel %vm2976_vm5, %v3097_v61, 0.0 }
 0x1fc   : > { %v3145_v5 = vsel %vm2976_vm5, %v3096_v3, 0.0  ;;  %v4333_v2 = vadd.f32 %v2885_v44, %v1803_v26 }
 0x1fd   : > { %v3146_v18 = vadd.f32 %v3145_v5, %v3144_v45  ;;  %2998 = vst.msk [vmem:[%s4618_s19 + $0xa8] sm:$0xff] %vm2976_vm5, %v4332_v53  ;;  %v3047_v19 = vadd.f32 %v3046_v57, %v3045_v54  ;;  %v3099_v31 = vmul.f32 %v4332_v53, %v4332_v53  ;;  %v4097_v11 = vpop.f32.mrb[22].mxu1  ;;  %v3050_v58 = vsel %vm2976_vm5, %v4332_v53, 0.0 }
 0x1fe   : > { %2997 = vst.msk [vmem:[%s4618_s19 + $0xa0] sm:$0xff] %vm2976_vm5, %v4333_v2  ;;  %v3048_v32 = vsel %vm2976_vm5, %v4333_v2, 0.0  ;;  %v3098_v41 = vmul.f32 %v4333_v2, %v4333_v2  ;;  %v4297_v42 = vpop.f32.mrb[22].mxu0  ;;  %v1813_v51 = vpop.f32.mrb[23].mxu1 }
 0x1ff   : > { %v3049_v50 = vadd.f32 %v3048_v32, %v3047_v19  ;;  %v3148_v14 = vadd.f32 %v3147_v20, %v3146_v18  ;;  %v4334_v25 = vadd.f32 %v4297_v42, %v4097_v11  ;;  %v2895_v21 = vpop.f32.mrb[23].mxu0  ;;  %v3151_v6 = vsel %vm2976_vm5, %v3099_v31, 0.0 }
 0x200   : > { %v3149_v52 = vsel %vm2976_vm5, %v3098_v41, 0.0  ;;  %v4335_v9 = vadd.f32 %v2895_v21, %v1813_v51 }
 0x201   : > { %v3150_v33 = vadd.f32 %v3149_v52, %v3148_v14  ;;  %3000 = vst.msk [vmem:[%s4618_s19 + $0xb8] sm:$0xff] %vm2976_vm5, %v4334_v25  ;;  %v3051_v59 = vadd.f32 %v3050_v58, %v3049_v50  ;;  %v3101_v7 = vmul.f32 %v4334_v25, %v4334_v25  ;;  %v4100_v28 = vpop.f32.mrb[24].mxu1  ;;  %v3054_v27 = vsel %vm2976_vm5, %v4334_v25, 0.0 }
 0x202   : > { %2999 = vst.msk [vmem:[%s4618_s19 + $0xb0] sm:$0xff] %vm2976_vm5, %v4335_v9  ;;  %v3052_v12 = vsel %vm2976_vm5, %v4335_v9, 0.0  ;;  %v3100_v62 = vmul.f32 %v4335_v9, %v4335_v9  ;;  %v4300_v29 = vpop.f32.mrb[24].mxu0  ;;  %v1823_v16 = vpop.f32.mrb[25].mxu1 }
 0x203   : > { %v3053_v36 = vadd.f32 %v3052_v12, %v3051_v59  ;;  %v3152_v47 = vadd.f32 %v3151_v6, %v3150_v33  ;;  %v4336_v48 = vadd.f32 %v4300_v29, %v4100_v28  ;;  %v2905_v24 = vpop.f32.mrb[25].mxu0  ;;  %v3155_v60 = vsel %vm2976_vm5, %v3101_v7, 0.0 }
 0x204   : > { %v3153_v34 = vsel %vm2976_vm5, %v3100_v62, 0.0  ;;  %v4337_v63 = vadd.f32 %v2905_v24, %v1823_v16 }
 0x205   : > { %v3154_v0 = vadd.f32 %v3153_v34, %v3152_v47  ;;  %3002 = vst.msk [vmem:[%s4618_s19 + $0xc8] sm:$0xff] %vm2976_vm5, %v4336_v48  ;;  %v3055_v15 = vadd.f32 %v3054_v27, %v3053_v36  ;;  %v3103_v46 = vmul.f32 %v4336_v48, %v4336_v48  ;;  %v4103_v30 = vpop.f32.mrb[26].mxu1  ;;  %v3058_v56 = vsel %vm2976_vm5, %v4336_v48, 0.0 }
 0x206   : > { %3001 = vst.msk [vmem:[%s4618_s19 + $0xc0] sm:$0xff] %vm2976_vm5, %v4337_v63  ;;  %v3056_v1 = vsel %vm2976_vm5, %v4337_v63, 0.0  ;;  %v3102_v17 = vmul.f32 %v4337_v63, %v4337_v63  ;;  %v4303_v38 = vpop.f32.mrb[26].mxu0  ;;  %v1833_v13 = vpop.f32.mrb[27].mxu1 }
 0x207   : > { %v3057_v10 = vadd.f32 %v3056_v1, %v3055_v15  ;;  %v3156_v4 = vadd.f32 %v3155_v60, %v3154_v0  ;;  %v4338_v35 = vadd.f32 %v4303_v38, %v4103_v30  ;;  %v2915_v39 = vpop.f32.mrb[27].mxu0  ;;  %v3159_v23 = vsel %vm2976_vm5, %v3103_v46, 0.0 }
 0x208   : > { %v3157_v40 = vsel %vm2976_vm5, %v3102_v17, 0.0  ;;  %v4339_v43 = vadd.f32 %v2915_v39, %v1833_v13 }
 0x209   : > { %v3158_v22 = vadd.f32 %v3157_v40, %v3156_v4  ;;  %3004 = vst.msk [vmem:[%s4618_s19 + $0xd8] sm:$0xff] %vm2976_vm5, %v4338_v35  ;;  %v3059_v8 = vadd.f32 %v3058_v56, %v3057_v10  ;;  %v3105_v61 = vmul.f32 %v4338_v35, %v4338_v35  ;;  %v4106_v49 = vpop.f32.mrb[28].mxu1  ;;  %v3062_v57 = vsel %vm2976_vm5, %v4338_v35, 0.0  ;;  %v3179_v35 = vld [vmem:[%s5895_s3] sm:$0x3] }
 0x20a   : > { %3003 = vst.msk [vmem:[%s4618_s19 + $0xd0] sm:$0xff] %vm2976_vm5, %v4339_v43  ;;  %v3060_v55 = vsel %vm2976_vm5, %v4339_v43, 0.0  ;;  %v3104_v3 = vmul.f32 %v4339_v43, %v4339_v43  ;;  %v4306_v37 = vpop.f32.mrb[28].mxu0  ;;  %v1843_v26 = vpop.f32.mrb[29].mxu1 }
 0x20b   : > { %v3061_v54 = vadd.f32 %v3060_v55, %v3059_v8  ;;  %v3160_v45 = vadd.f32 %v3159_v23, %v3158_v22  ;;  %v4340_v53 = vadd.f32 %v4306_v37, %v4106_v49  ;;  %v2925_v44 = vpop.f32.mrb[29].mxu0  ;;  %v3163_v20 = vsel %vm2976_vm5, %v3105_v61, 0.0 }
 0x20c   : > { %v3161_v5 = vsel %vm2976_vm5, %v3104_v3, 0.0  ;;  %v4341_v2 = vadd.f32 %v2925_v44, %v1843_v26 }
 0x20d   : > { %v3162_v18 = vadd.f32 %v3161_v5, %v3160_v45  ;;  %3006 = vst.msk [vmem:[%s4618_s19 + $0xe8] sm:$0xff] %vm2976_vm5, %v4340_v53  ;;  %v3063_v19 = vadd.f32 %v3062_v57, %v3061_v54  ;;  %v3107_v31 = vmul.f32 %v4340_v53, %v4340_v53  ;;  %v4109_v11 = vpop.f32.mrb[30].mxu1  ;;  %v3066_v58 = vsel %vm2976_vm5, %v4340_v53, 0.0 }
 0x20e   : > { %3005 = vst.msk [vmem:[%s4618_s19 + $0xe0] sm:$0xff] %vm2976_vm5, %v4341_v2  ;;  %v3064_v32 = vsel %vm2976_vm5, %v4341_v2, 0.0  ;;  %v3106_v41 = vmul.f32 %v4341_v2, %v4341_v2  ;;  %v4309_v42 = vpop.f32.mrb[30].mxu0  ;;  %v1853_v51 = vpop.f32.mrb[31].mxu1 }
 0x20f   : > { %v3065_v50 = vadd.f32 %v3064_v32, %v3063_v19  ;;  %v3164_v14 = vadd.f32 %v3163_v20, %v3162_v18  ;;  %v4342_v25 = vadd.f32 %v4309_v42, %v4109_v11  ;;  %v2935_v21 = vpop.f32.mrb[31].mxu0  ;;  %v3167_v12 = vsel %vm2976_vm5, %v3107_v31, 0.0 }
 0x210   : > { %v3165_v52 = vsel %vm2976_vm5, %v3106_v41, 0.0  ;;  %v4343_v9 = vadd.f32 %v2935_v21, %v1853_v51 }
 0x211   : > { %v3166_v33 = vadd.f32 %v3165_v52, %v3164_v14  ;;  %3008 = vst.msk [vmem:[%s4618_s19 + $0xf8] sm:$0xff] %vm2976_vm5, %v4342_v25  ;;  %v3070_v59 = vsel %vm2976_vm5, %v4342_v25, 0.0  ;;  %v3109_v6 = vmul.f32 %v4342_v25, %v4342_v25  ;;  %v3067_v7 = vadd.f32 %v3066_v58, %v3065_v50 }
 0x212   : > { %3007 = vst.msk [vmem:[%s4618_s19 + $0xf0] sm:$0xff] %vm2976_vm5, %v4343_v9  ;;  %v3068_v62 = vsel %vm2976_vm5, %v4343_v9, 0.0  ;;  %v3108_v28 = vmul.f32 %v4343_v9, %v4343_v9 }
 0x213   : > { %v3171_v29 = vsel %vm2976_vm5, %v3109_v6, 0.0  ;;  %v3069_v36 = vadd.f32 %v3068_v62, %v3067_v7  ;;  %v3168_v47 = vadd.f32 %v3167_v12, %v3166_v33 }
 0x214   : > { %v3169_v48 = vsel %vm2976_vm5, %v3108_v28, 0.0 }
 0x215   : > { %v3071_v16 = vadd.f32 %v3070_v59, %v3069_v36  ;;  %v3170_v24 = vadd.f32 %v3169_v48, %v3168_v47 }
 0x217   : > { %v3072_v27 = vrot.slane %v3071_v16, 4  ;;  %v3172_v34 = vadd.f32 %v3171_v29, %v3170_v24 }
 0x219   : > { %v3073_v63 = vadd.f32 %v3072_v27, %v3071_v16  ;;  %v3173_v0 = vrot.slane %v3172_v34, 4 }
 0x21b   : > { %v3074_v15 = vrot.slane %v3073_v63, 2  ;;  %v3174_v60 = vadd.f32 %v3173_v0, %v3172_v34 }
 0x21d   : > { %v3075_v46 = vadd.f32 %v3074_v15, %v3073_v63  ;;  %v3175_v1 = vrot.slane %v3174_v60, 2 }
 0x21f   : > { %v3076_v17 = vrot.slane %v3075_v46, 1  ;;  %v3176_v30 = vadd.f32 %v3175_v1, %v3174_v60 }
 0x221   : > { %v3177_v38 = vrot.slane %v3176_v30, 1  ;;  %v3077_v10 = vadd.f32 %v3076_v17, %v3075_v46 }
 0x223   : > { %v3178_v4 = vadd.f32 %v3177_v38, %v3176_v30 }
 0x225   : > { %v3181_v13 = vsel %vm3180_vm6, %v3077_v10, %v3178_v4 }
 0x226   : > { %v3182_v39 = vadd.f32 %v3181_v13, %v3179_v35 }
 0x228   : > { %3184 = vst.msk [vmem:[%s5895_s3] sm:$0x3] %vm3183_vm7, %v3182_v39 }
 0x229 PF: > { %s14_s12 = sadd.s32 1, %s4584_s12  }
 0x22a   : > { %p11_p5 = scmp.ge.s32.totalorder %s14_s12, 4  }
 0x22c   :  { %13 = sbr.rel (!%p11_p5) target bundleno = 1 (0x1), region = 78 }

</bundles_post_ra>
